<compile_context>
chip_gen: v5e
topology: v5e:2x2
jax: 0.10.0
libtpu: 0.0.40
codegen_flags: <defaults>
</compile_context>

<pallas_src>
import jax
import jax.numpy as jnp
from jax import lax
from jax.experimental import pallas as pl
from jax.experimental.pallas import tpu as pltpu

VMEM_SPEC = pl.BlockSpec(memory_space=pltpu.MemorySpace.VMEM)


# ---------------------------------------------------------------------------
# Fused Pallas kernel (single block, everything lives in VMEM)
# ---------------------------------------------------------------------------
def _make_hgcn_kernel(offsets, inv_total):
    """offsets: dict name -> (row, n_rows, n_cols) into the packed param slab.
    inv_total = 1 / (2 * output_size), baked in as a compile-time constant."""

    def kernel(er_ref, ec_ref, x_ref, x1_ref, p_ref, o_ref):
        f32 = jnp.float32
        n = x_ref.shape[0]          # nodes
        ne = er_ref.shape[1]        # edges

        def getp(name):             # static, 8-row-aligned slice of the param slab
            r, nr, nc = offsets[name]
            return p_ref[r:r + nr, 0:nc]

        # --- in-kernel one-hot masks / adjacency from int32 edge indices -------
        iota_ne = lax.broadcasted_iota(jnp.int32, (n, ne), 0)   # node id along rows
        iota_en = lax.broadcasted_iota(jnp.int32, (ne, n), 1)   # node id along lanes
        eye = (lax.broadcasted_iota(jnp.int32, (n, n), 0)
               == lax.broadcasted_iota(jnp.int32, (n, n), 1)).astype(f32)

        def graph_ops(g):
            dst_row = er_ref[2 * g + 1:2 * g + 2, :]            # [1, E]
            src_col = ec_ref[:, 2 * g:2 * g + 1]                # [E, 1]
            dst_col = ec_ref[:, 2 * g + 1:2 * g + 2]            # [E, 1]
            src_oh = (iota_en == src_col).astype(f32)           # [E, N]
            dst_oh = (iota_en == dst_col).astype(f32)           # [E, N]
            dst_ohT = (iota_ne == dst_row).astype(f32)          # [N, E]
            # A[dst, src] += 1 (duplicate edges accumulate, as in the reference)
            adj = jnp.dot(dst_ohT, src_oh, preferred_element_type=f32)   # [N, N]
            return adj, src_oh, dst_oh, dst_ohT

        adj0, src_oh0, dst_oh0, dst_ohT0 = graph_ops(0)
        adj1, src_oh1, dst_oh1, dst_ohT1 = graph_ops(1)

        # --- Stage 1: GCN on both graphs, ReLU, cross-add -----------------------
        def gcn(adj, xin, w, b):
            a_i = adj + eye
            deg = jnp.sum(a_i, axis=1, keepdims=True)                    # [N, 1]
            dinv = jnp.where(deg > 0, lax.rsqrt(deg), 0.0)
            ax = dinv * jnp.dot(a_i, dinv * xin, preferred_element_type=f32)
            return jnp.dot(ax, w, preferred_element_type=f32) + b

        xg = gcn(adj0, x_ref[...], getp("w1g"), getp("b1g"))
        x1g = gcn(adj1, x1_ref[...], getp("w2g"), getp("b2g"))
        r0 = jnp.maximum(xg, 0.0)
        r1 = jnp.maximum(x1g, 0.0)
        x0_in = r0 + r1        # branch 1 SAGE input
        x1_in = r1 + x1g       # branch 2: relu(x1) + pre-ReLU x1 (as in torch code)

        # --- per-branch SAGE -> GAT pooling --------------------------------------
        def branch(xin, adj, src_oh, dst_oh, dst_ohT, wlr, bs, gw, gb, ga, ab):
            # SAGE: one fused [agg | xin] @ [Wl; Wr]
            degm = jnp.sum(adj, axis=1, keepdims=True)
            inv_degm = jnp.where(degm > 0, 1.0 / jnp.maximum(degm, 1.0), 0.0)
            agg = inv_degm * jnp.dot(adj, xin, preferred_element_type=f32)   # [N, NH]
            xs = (jnp.dot(jnp.concatenate([agg, xin], axis=1), wlr,
                          preferred_element_type=f32) + bs)                  # [N, NH2]
            # GAT pooling: project once, fused src/dst scores, one-matmul edge gather
            h = jnp.dot(xs, gw, preferred_element_type=f32) + gb             # [N, NH4]
            s2 = jnp.dot(h, ga, preferred_element_type=f32)                  # [N, 2]
            cat_oh = jnp.concatenate([src_oh, dst_oh], axis=1)               # [E, 2N]
            s_stack = jnp.concatenate([s2[:, 0:1], s2[:, 1:2]], axis=0)      # [2N, 1]
            e = jnp.dot(cat_oh, s_stack, preferred_element_type=f32) + ab    # [E, 1]
            e = jnp.where(e > 0, e, 0.2 * e)                                 # leaky_relu
            m = jnp.max(e, axis=0, keepdims=True)
            p = jnp.exp(e - m)
            attn = p / jnp.sum(p, axis=0, keepdims=True)                     # [E, 1]
            w_node = jnp.dot(dst_ohT, attn, preferred_element_type=f32)      # [N, 1]
            return jnp.sum(h * w_node, axis=0, keepdims=True)                # [1, NH4]

        pooled0 = branch(x0_in, adj0, src_oh0, dst_oh0, dst_ohT0,
                         getp("wlr1"), getp("bs1"), getp("gw1"), getp("gb1"),
                         getp("ga1"), getp("ab1"))
        pooled1 = branch(x1_in, adj1, src_oh1, dst_oh1, dst_ohT1,
                         getp("wlr2"), getp("bs2"), getp("gw2"), getp("gb2"),
                         getp("ga2"), getp("ab2"))

        # --- shared MLP head, run ONCE on stacked [2, NH4] ----------------------
        z = jnp.maximum(jnp.concatenate([pooled0, pooled1], axis=0), 0.0)
        # dropout(p=0.2) = identity at inference
        h1 = jnp.dot(z, getp("wm1"), preferred_element_type=f32) + getp("bm1")
        mu = jnp.mean(h1, axis=-1, keepdims=True)
        var = jnp.mean((h1 - mu) * (h1 - mu), axis=-1, keepdims=True)
        hn = (h1 - mu) * lax.rsqrt(var + 1e-5) * getp("gamma") + getp("beta")
        y = jnp.dot(hn, getp("wm2"), preferred_element_type=f32) + getp("bm2")   # [2, OUT]

        # concat + global mean == sum(all elements) / (2 * output_size)
        o_ref[...] = jnp.sum(y, keepdims=True) * inv_total

    return kernel


# ---------------------------------------------------------------------------
# Parameters (deterministic init mirroring module __init__)
# ---------------------------------------------------------------------------
def linear_params(key, in_f, out_f):
    k1, k2 = jax.random.split(key)
    lim = 1.0 / jnp.sqrt(float(in_f))
    w = jax.random.uniform(k1, (out_f, in_f), jnp.float32, -lim, lim)
    b = jax.random.uniform(k2, (out_f,), jnp.float32, -lim, lim)
    return w, b


def init_hgcn_params(key, node_features, input_size, n_hidden, output_size):
    nh, nh2, nh4 = n_hidden, n_hidden // 2, n_hidden // 4
    keys = jax.random.split(key, 12)
    p = {}
    p["conv1_1"] = linear_params(keys[0], node_features, nh)            # GCN
    p["conv2_1"] = linear_params(keys[1], input_size, nh)               # GCN
    p["conv1_2"] = (*linear_params(keys[2], nh, nh2),
                    linear_params(keys[3], nh, nh2)[0])                 # (wl, b, wr)
    p["conv2_2"] = (*linear_params(keys[4], nh, nh2),
                    linear_params(keys[5], nh, nh2)[0])
    p["conv1_3"] = (linear_params(keys[6], nh2, nh4),                   # W
                    linear_params(keys[7], 2 * nh4, 1))                 # a
    p["conv2_3"] = (linear_params(keys[8], nh2, nh4),
                    linear_params(keys[9], 2 * nh4, 1))
    p["mlp_lin1"] = linear_params(keys[10], nh4, nh4)
    p["mlp_ln"] = (jnp.ones((nh4,), jnp.float32), jnp.zeros((nh4,), jnp.float32))
    p["mlp_lin2"] = linear_params(keys[11], nh4, output_size)
    return p


def pack_params(p, n_hidden):
    """One-time packing into a single [R, 32] f32 slab (weights pre-transposed to
    [in, out], SAGE Wl/Wr and GAT a_src/a_dst pre-stacked). Entry starts are
    aligned to 8 rows so in-kernel static slices are sublane-tile aligned."""
    nh4 = n_hidden // 4
    entries = []
    w, b = p["conv1_1"]; entries += [("w1g", w.T), ("b1g", b.reshape(1, -1))]
    w, b = p["conv2_1"]; entries += [("w2g", w.T), ("b2g", b.reshape(1, -1))]
    wl, bl, wr = p["conv1_2"]
    entries += [("wlr1", jnp.concatenate([wl.T, wr.T], axis=0)), ("bs1", bl.reshape(1, -1))]
    wl, bl, wr = p["conv2_2"]
    entries += [("wlr2", jnp.concatenate([wl.T, wr.T], axis=0)), ("bs2", bl.reshape(1, -1))]
    (gw, gb), (aw, ab) = p["conv1_3"]
    entries += [("gw1", gw.T), ("gb1", gb.reshape(1, -1)),
                ("ga1", jnp.concatenate([aw[:, :nh4].T, aw[:, nh4:].T], axis=1)),
                ("ab1", ab.reshape(1, 1))]
    (gw, gb), (aw, ab) = p["conv2_3"]
    entries += [("gw2", gw.T), ("gb2", gb.reshape(1, -1)),
                ("ga2", jnp.concatenate([aw[:, :nh4].T, aw[:, nh4:].T], axis=1)),
                ("ab2", ab.reshape(1, 1))]
    w, b = p["mlp_lin1"]; entries += [("wm1", w.T), ("bm1", b.reshape(1, -1))]
    entries += [("gamma", p["mlp_ln"][0].reshape(1, -1)),
                ("beta", p["mlp_ln"][1].reshape(1, -1))]
    w, b = p["mlp_lin2"]; entries += [("wm2", w.T), ("bm2", b.reshape(1, -1))]

    width = max(int(a.shape[1]) for _, a in entries)
    offsets, row = {}, 0
    for name, a in entries:
        offsets[name] = (row, int(a.shape[0]), int(a.shape[1]))
        row += -(-int(a.shape[0]) // 8) * 8
    slab = jnp.zeros((row, width), jnp.float32)
    for name, a in entries:
        r, nr, nc = offsets[name]
        slab = slab.at[r:r + nr, :nc].set(a.astype(jnp.float32))
    return slab, offsets


# ---------------------------------------------------------------------------
# Forward builder: one fused pallas_call, 5 inputs total
# ---------------------------------------------------------------------------
def build_forward(offsets, output_size):
    kernel = _make_hgcn_kernel(offsets, 1.0 / (2.0 * float(output_size)))

    def forward(slab, x, x1, edge_index, edge_index1):
        er = jnp.concatenate([edge_index, edge_index1], axis=0).astype(jnp.int32)  # [4, E]
        ec = er.T                                                                   # [E, 4]
        args = (er, ec, x, x1, slab)
        return pl.pallas_call(
            kernel,
            out_shape=jax.ShapeDtypeStruct((1, 1), jnp.float32),
            in_specs=[VMEM_SPEC] * len(args),
            out_specs=VMEM_SPEC,
        )(*args)

    return forward


# ---------------------------------------------------------------------------
if __name__ == "__main__":
    N = 16            # nodes per graph (both graphs share N so the cross-add is valid)
    E = 32            # edges per graph
    NODE_FEATURES = 8
    INPUT_SIZE = 8
    N_HIDDEN = 32
    OUTPUT_SIZE = 4

    root = jax.random.PRNGKey(0)
    k_x, k_x1, k_e, k_e1, k_p = jax.random.split(root, 5)

    x = jax.random.normal(k_x, (N, NODE_FEATURES), jnp.float32)
    x1 = jax.random.normal(k_x1, (N, INPUT_SIZE), jnp.float32)
    edge_index = jax.random.randint(k_e, (2, E), 0, N, jnp.int32)
    edge_index1 = jax.random.randint(k_e1, (2, E), 0, N, jnp.int32)

    params = init_hgcn_params(k_p, NODE_FEATURES, INPUT_SIZE, N_HIDDEN, OUTPUT_SIZE)
    slab, offsets = pack_params(params, N_HIDDEN)       # one-time layout prep

    forward = jax.jit(build_forward(offsets, OUTPUT_SIZE))
    out = forward(slab, x, x1, edge_index, edge_index1)
    out = jax.block_until_ready(out)
    assert out.shape == (1, 1) and out.dtype == jnp.float32
    assert bool(jnp.isfinite(out).all())
    print("KERNEL_OK")
</pallas_src>

<mosaic_0001>
module attributes {stable_mosaic.version = 11 : i64} {
  func.func @kernel(%arg0: memref<4x32xi32, #tpu.memory_space<vmem>>, %arg1: memref<32x4xi32, #tpu.memory_space<vmem>>, %arg2: memref<16x8xf32, #tpu.memory_space<vmem>>, %arg3: memref<16x8xf32, #tpu.memory_space<vmem>>, %arg4: memref<304x32xf32, #tpu.memory_space<vmem>>, %arg5: memref<1x1xf32, #tpu.memory_space<vmem>>) attributes {dimension_semantics = [], scalar_prefetch = 0 : i64, scratch_operands = 0 : i64, tpu.core_type = #tpu.core_type<tc>} {
    %0 = tpu.iota {dimensions = array<i32: 0>} : vector<16x32xi32>
    %1 = tpu.iota {dimensions = array<i32: 1>} : vector<32x16xi32>
    %2 = tpu.iota {dimensions = array<i32: 0>} : vector<16x16xi32>
    %3 = tpu.iota {dimensions = array<i32: 1>} : vector<16x16xi32>
    %4 = arith.cmpi eq, %2, %3 : vector<16x16xi32>
    %5 = arith.extui %4 : vector<16x16xi1> to vector<16x16xi32>
    %6 = arith.sitofp %5 : vector<16x16xi32> to vector<16x16xf32>
    %c1 = arith.constant 1 : index
    %c0 = arith.constant 0 : index
    %7 = vector.load %arg0[%c1, %c0] : memref<4x32xi32, #tpu.memory_space<vmem>>, vector<1x32xi32>
    %c0_0 = arith.constant 0 : index
    %c0_1 = arith.constant 0 : index
    %8 = vector.load %arg1[%c0_0, %c0_1] : memref<32x4xi32, #tpu.memory_space<vmem>>, vector<32x1xi32>
    %c0_2 = arith.constant 0 : index
    %c1_3 = arith.constant 1 : index
    %9 = vector.load %arg1[%c0_2, %c1_3] : memref<32x4xi32, #tpu.memory_space<vmem>>, vector<32x1xi32>
    %10 = vector.broadcast %8 : vector<32x1xi32> to vector<32x16xi32>
    %11 = arith.cmpi eq, %1, %10 : vector<32x16xi32>
    %12 = arith.extui %11 : vector<32x16xi1> to vector<32x16xi32>
    %13 = arith.sitofp %12 : vector<32x16xi32> to vector<32x16xf32>
    %14 = vector.broadcast %9 : vector<32x1xi32> to vector<32x16xi32>
    %15 = arith.cmpi eq, %1, %14 : vector<32x16xi32>
    %16 = arith.extui %15 : vector<32x16xi1> to vector<32x16xi32>
    %17 = arith.sitofp %16 : vector<32x16xi32> to vector<32x16xf32>
    %18 = vector.broadcast %7 : vector<1x32xi32> to vector<16x32xi32>
    %19 = arith.cmpi eq, %0, %18 : vector<16x32xi32>
    %20 = arith.extui %19 : vector<16x32xi1> to vector<16x32xi32>
    %21 = arith.sitofp %20 : vector<16x32xi32> to vector<16x32xf32>
    %cst = arith.constant dense<0.000000e+00> : vector<16x16xf32>
    %22 = tpu.matmul %21, %13, %cst {dimension_numbers = #tpu.dot_dimension_numbers<[1], [0], [0], [1], [0, 0, 1, 1], [], []>} : vector<16x32xf32>, vector<32x16xf32>, vector<16x16xf32> -> vector<16x16xf32>
    %c3 = arith.constant 3 : index
    %c0_4 = arith.constant 0 : index
    %23 = vector.load %arg0[%c3, %c0_4] : memref<4x32xi32, #tpu.memory_space<vmem>>, vector<1x32xi32>
    %c0_5 = arith.constant 0 : index
    %c2 = arith.constant 2 : index
    %24 = vector.load %arg1[%c0_5, %c2] : memref<32x4xi32, #tpu.memory_space<vmem>>, vector<32x1xi32>
    %c0_6 = arith.constant 0 : index
    %c3_7 = arith.constant 3 : index
    %25 = vector.load %arg1[%c0_6, %c3_7] : memref<32x4xi32, #tpu.memory_space<vmem>>, vector<32x1xi32>
    %26 = vector.broadcast %24 : vector<32x1xi32> to vector<32x16xi32>
    %27 = arith.cmpi eq, %1, %26 : vector<32x16xi32>
    %28 = arith.extui %27 : vector<32x16xi1> to vector<32x16xi32>
    %29 = arith.sitofp %28 : vector<32x16xi32> to vector<32x16xf32>
    %30 = vector.broadcast %25 : vector<32x1xi32> to vector<32x16xi32>
    %31 = arith.cmpi eq, %1, %30 : vector<32x16xi32>
    %32 = arith.extui %31 : vector<32x16xi1> to vector<32x16xi32>
    %33 = arith.sitofp %32 : vector<32x16xi32> to vector<32x16xf32>
    %34 = vector.broadcast %23 : vector<1x32xi32> to vector<16x32xi32>
    %35 = arith.cmpi eq, %0, %34 : vector<16x32xi32>
    %36 = arith.extui %35 : vector<16x32xi1> to vector<16x32xi32>
    %37 = arith.sitofp %36 : vector<16x32xi32> to vector<16x32xf32>
    %cst_8 = arith.constant dense<0.000000e+00> : vector<16x16xf32>
    %38 = tpu.matmul %37, %29, %cst_8 {dimension_numbers = #tpu.dot_dimension_numbers<[1], [0], [0], [1], [0, 0, 1, 1], [], []>} : vector<16x32xf32>, vector<32x16xf32>, vector<16x16xf32> -> vector<16x16xf32>
    %c0_9 = arith.constant 0 : index
    %c0_10 = arith.constant 0 : index
    %39 = vector.load %arg2[%c0_9, %c0_10] : memref<16x8xf32, #tpu.memory_space<vmem>>, vector<16x8xf32>
    %c0_11 = arith.constant 0 : index
    %c0_12 = arith.constant 0 : index
    %40 = vector.load %arg4[%c0_11, %c0_12] : memref<304x32xf32, #tpu.memory_space<vmem>>, vector<8x32xf32>
    %c8 = arith.constant 8 : index
    %c0_13 = arith.constant 0 : index
    %41 = vector.load %arg4[%c8, %c0_13] : memref<304x32xf32, #tpu.memory_space<vmem>>, vector<1x32xf32>
    %42 = arith.addf %22, %6 : vector<16x16xf32>
    %cst_14 = arith.constant dense<0.000000e+00> : vector<16xf32>
    %43 = vector.multi_reduction <add>, %42, %cst_14 [1] : vector<16x16xf32> to vector<16xf32>
    %44 = vector.shape_cast %43 : vector<16xf32> to vector<16x1xf32>
    %cst_15 = arith.constant 0.000000e+00 : f32
    %45 = vector.broadcast %cst_15 : f32 to vector<16x1xf32>
    %46 = arith.cmpf ogt, %44, %45 : vector<16x1xf32>
    %47 = math.rsqrt %44 : vector<16x1xf32>
    %cst_16 = arith.constant 0.000000e+00 : f32
    %48 = vector.broadcast %cst_16 : f32 to vector<16x1xf32>
    %49 = arith.select %46, %47, %48 : vector<16x1xi1>, vector<16x1xf32>
    %50 = vector.broadcast %49 : vector<16x1xf32> to vector<16x8xf32>
    %51 = arith.mulf %50, %39 : vector<16x8xf32>
    %cst_17 = arith.constant dense<0.000000e+00> : vector<16x8xf32>
    %52 = tpu.matmul %42, %51, %cst_17 {dimension_numbers = #tpu.dot_dimension_numbers<[1], [0], [0], [1], [0, 0, 1, 1], [], []>} : vector<16x16xf32>, vector<16x8xf32>, vector<16x8xf32> -> vector<16x8xf32>
    %53 = vector.broadcast %49 : vector<16x1xf32> to vector<16x8xf32>
    %54 = arith.mulf %53, %52 : vector<16x8xf32>
    %cst_18 = arith.constant dense<0.000000e+00> : vector<16x32xf32>
    %55 = tpu.matmul %54, %40, %cst_18 {dimension_numbers = #tpu.dot_dimension_numbers<[1], [0], [0], [1], [0, 0, 1, 1], [], []>} : vector<16x8xf32>, vector<8x32xf32>, vector<16x32xf32> -> vector<16x32xf32>
    %56 = vector.broadcast %41 : vector<1x32xf32> to vector<16x32xf32>
    %57 = arith.addf %55, %56 : vector<16x32xf32>
    %c0_19 = arith.constant 0 : index
    %c0_20 = arith.constant 0 : index
    %58 = vector.load %arg3[%c0_19, %c0_20] : memref<16x8xf32, #tpu.memory_space<vmem>>, vector<16x8xf32>
    %c16 = arith.constant 16 : index
    %c0_21 = arith.constant 0 : index
    %59 = vector.load %arg4[%c16, %c0_21] : memref<304x32xf32, #tpu.memory_space<vmem>>, vector<8x32xf32>
    %c24 = arith.constant 24 : index
    %c0_22 = arith.constant 0 : index
    %60 = vector.load %arg4[%c24, %c0_22] : memref<304x32xf32, #tpu.memory_space<vmem>>, vector<1x32xf32>
    %61 = arith.addf %38, %6 : vector<16x16xf32>
    %cst_23 = arith.constant dense<0.000000e+00> : vector<16xf32>
    %62 = vector.multi_reduction <add>, %61, %cst_23 [1] : vector<16x16xf32> to vector<16xf32>
    %63 = vector.shape_cast %62 : vector<16xf32> to vector<16x1xf32>
    %cst_24 = arith.constant 0.000000e+00 : f32
    %64 = vector.broadcast %cst_24 : f32 to vector<16x1xf32>
    %65 = arith.cmpf ogt, %63, %64 : vector<16x1xf32>
    %66 = math.rsqrt %63 : vector<16x1xf32>
    %cst_25 = arith.constant 0.000000e+00 : f32
    %67 = vector.broadcast %cst_25 : f32 to vector<16x1xf32>
    %68 = arith.select %65, %66, %67 : vector<16x1xi1>, vector<16x1xf32>
    %69 = vector.broadcast %68 : vector<16x1xf32> to vector<16x8xf32>
    %70 = arith.mulf %69, %58 : vector<16x8xf32>
    %cst_26 = arith.constant dense<0.000000e+00> : vector<16x8xf32>
    %71 = tpu.matmul %61, %70, %cst_26 {dimension_numbers = #tpu.dot_dimension_numbers<[1], [0], [0], [1], [0, 0, 1, 1], [], []>} : vector<16x16xf32>, vector<16x8xf32>, vector<16x8xf32> -> vector<16x8xf32>
    %72 = vector.broadcast %68 : vector<16x1xf32> to vector<16x8xf32>
    %73 = arith.mulf %72, %71 : vector<16x8xf32>
    %cst_27 = arith.constant dense<0.000000e+00> : vector<16x32xf32>
    %74 = tpu.matmul %73, %59, %cst_27 {dimension_numbers = #tpu.dot_dimension_numbers<[1], [0], [0], [1], [0, 0, 1, 1], [], []>} : vector<16x8xf32>, vector<8x32xf32>, vector<16x32xf32> -> vector<16x32xf32>
    %75 = vector.broadcast %60 : vector<1x32xf32> to vector<16x32xf32>
    %76 = arith.addf %74, %75 : vector<16x32xf32>
    %cst_28 = arith.constant 0.000000e+00 : f32
    %77 = vector.broadcast %cst_28 : f32 to vector<16x32xf32>
    %78 = arith.maximumf %57, %77 : vector<16x32xf32>
    %cst_29 = arith.constant 0.000000e+00 : f32
    %79 = vector.broadcast %cst_29 : f32 to vector<16x32xf32>
    %80 = arith.maximumf %76, %79 : vector<16x32xf32>
    %81 = arith.addf %78, %80 : vector<16x32xf32>
    %82 = arith.addf %80, %76 : vector<16x32xf32>
    %c32 = arith.constant 32 : index
    %c0_30 = arith.constant 0 : index
    %83 = vector.load %arg4[%c32, %c0_30] : memref<304x32xf32, #tpu.memory_space<vmem>>, vector<64x16xf32>
    %c96 = arith.constant 96 : index
    %c0_31 = arith.constant 0 : index
    %84 = vector.load %arg4[%c96, %c0_31] : memref<304x32xf32, #tpu.memory_space<vmem>>, vector<1x16xf32>
    %c176 = arith.constant 176 : index
    %c0_32 = arith.constant 0 : index
    %85 = vector.load %arg4[%c176, %c0_32] : memref<304x32xf32, #tpu.memory_space<vmem>>, vector<16x8xf32>
    %c192 = arith.constant 192 : index
    %c0_33 = arith.constant 0 : index
    %86 = vector.load %arg4[%c192, %c0_33] : memref<304x32xf32, #tpu.memory_space<vmem>>, vector<1x8xf32>
    %c200 = arith.constant 200 : index
    %c0_34 = arith.constant 0 : index
    %87 = vector.load %arg4[%c200, %c0_34] : memref<304x32xf32, #tpu.memory_space<vmem>>, vector<8x2xf32>
    %c208 = arith.constant 208 : index
    %c0_35 = arith.constant 0 : index
    %88 = vector.load %arg4[%c208, %c0_35] : memref<304x32xf32, #tpu.memory_space<vmem>>, vector<1x1xf32>
    %cst_36 = arith.constant dense<0.000000e+00> : vector<16xf32>
    %89 = vector.multi_reduction <add>, %22, %cst_36 [1] : vector<16x16xf32> to vector<16xf32>
    %90 = vector.shape_cast %89 : vector<16xf32> to vector<16x1xf32>
    %cst_37 = arith.constant 0.000000e+00 : f32
    %91 = vector.broadcast %cst_37 : f32 to vector<16x1xf32>
    %92 = arith.cmpf ogt, %90, %91 : vector<16x1xf32>
    %cst_38 = arith.constant 1.000000e+00 : f32
    %93 = vector.broadcast %cst_38 : f32 to vector<16x1xf32>
    %94 = arith.maximumf %90, %93 : vector<16x1xf32>
    %cst_39 = arith.constant 1.000000e+00 : f32
    %95 = vector.broadcast %cst_39 : f32 to vector<16x1xf32>
    %96 = arith.divf %95, %94 : vector<16x1xf32>
    %cst_40 = arith.constant 0.000000e+00 : f32
    %97 = vector.broadcast %cst_40 : f32 to vector<16x1xf32>
    %98 = arith.select %92, %96, %97 : vector<16x1xi1>, vector<16x1xf32>
    %cst_41 = arith.constant dense<0.000000e+00> : vector<16x32xf32>
    %99 = tpu.matmul %22, %81, %cst_41 {dimension_numbers = #tpu.dot_dimension_numbers<[1], [0], [0], [1], [0, 0, 1, 1], [], []>} : vector<16x16xf32>, vector<16x32xf32>, vector<16x32xf32> -> vector<16x32xf32>
    %100 = vector.broadcast %98 : vector<16x1xf32> to vector<16x32xf32>
    %101 = arith.mulf %100, %99 : vector<16x32xf32>
    %102 = tpu.concatenate %101, %81 in 1 : vector<16x32xf32>, vector<16x32xf32> -> vector<16x64xf32>
    %cst_42 = arith.constant dense<0.000000e+00> : vector<16x16xf32>
    %103 = tpu.matmul %102, %83, %cst_42 {dimension_numbers = #tpu.dot_dimension_numbers<[1], [0], [0], [1], [0, 0, 1, 1], [], []>} : vector<16x64xf32>, vector<64x16xf32>, vector<16x16xf32> -> vector<16x16xf32>
    %104 = vector.broadcast %84 : vector<1x16xf32> to vector<16x16xf32>
    %105 = arith.addf %103, %104 : vector<16x16xf32>
    %cst_43 = arith.constant dense<0.000000e+00> : vector<16x8xf32>
    %106 = tpu.matmul %105, %85, %cst_43 {dimension_numbers = #tpu.dot_dimension_numbers<[1], [0], [0], [1], [0, 0, 1, 1], [], []>} : vector<16x16xf32>, vector<16x8xf32>, vector<16x8xf32> -> vector<16x8xf32>
    %107 = vector.broadcast %86 : vector<1x8xf32> to vector<16x8xf32>
    %108 = arith.addf %106, %107 : vector<16x8xf32>
    %cst_44 = arith.constant dense<0.000000e+00> : vector<16x2xf32>
    %109 = tpu.matmul %108, %87, %cst_44 {dimension_numbers = #tpu.dot_dimension_numbers<[1], [0], [0], [1], [0, 0, 1, 1], [], []>} : vector<16x8xf32>, vector<8x2xf32>, vector<16x2xf32> -> vector<16x2xf32>
    %110 = tpu.concatenate %13, %17 in 1 : vector<32x16xf32>, vector<32x16xf32> -> vector<32x32xf32>
    %111 = vector.extract_strided_slice %109 {offsets = [0, 0], sizes = [16, 1], strides = [1, 1]} : vector<16x2xf32> to vector<16x1xf32>
    %112 = vector.extract_strided_slice %109 {offsets = [0, 1], sizes = [16, 1], strides = [1, 1]} : vector<16x2xf32> to vector<16x1xf32>
    %113 = tpu.concatenate %111, %112 in 0 : vector<16x1xf32>, vector<16x1xf32> -> vector<32x1xf32>
    %cst_45 = arith.constant dense<0.000000e+00> : vector<32x1xf32>
    %114 = tpu.matmul %110, %113, %cst_45 {dimension_numbers = #tpu.dot_dimension_numbers<[1], [0], [0], [1], [0, 0, 1, 1], [], []>} : vector<32x32xf32>, vector<32x1xf32>, vector<32x1xf32> -> vector<32x1xf32>
    %115 = vector.broadcast %88 : vector<1x1xf32> to vector<32x1xf32>
    %116 = arith.addf %114, %115 : vector<32x1xf32>
    %cst_46 = arith.constant 0.000000e+00 : f32
    %117 = vector.broadcast %cst_46 : f32 to vector<32x1xf32>
    %118 = arith.cmpf ogt, %116, %117 : vector<32x1xf32>
    %cst_47 = arith.constant 2.000000e-01 : f32
    %119 = vector.broadcast %cst_47 : f32 to vector<32x1xf32>
    %120 = arith.mulf %119, %116 : vector<32x1xf32>
    %121 = arith.select %118, %116, %120 : vector<32x1xi1>, vector<32x1xf32>
    %cst_48 = arith.constant dense<0xFF800000> : vector<1xf32>
    %122 = vector.multi_reduction <maximumf>, %121, %cst_48 [0] : vector<32x1xf32> to vector<1xf32>
    %123 = vector.shape_cast %122 : vector<1xf32> to vector<1x1xf32>
    %124 = vector.broadcast %123 : vector<1x1xf32> to vector<32x1xf32>
    %125 = arith.subf %121, %124 : vector<32x1xf32>
    %126 = math.exp %125 : vector<32x1xf32>
    %cst_49 = arith.constant dense<0.000000e+00> : vector<1xf32>
    %127 = vector.multi_reduction <add>, %126, %cst_49 [0] : vector<32x1xf32> to vector<1xf32>
    %128 = vector.shape_cast %127 : vector<1xf32> to vector<1x1xf32>
    %129 = vector.broadcast %128 : vector<1x1xf32> to vector<32x1xf32>
    %130 = arith.divf %126, %129 : vector<32x1xf32>
    %cst_50 = arith.constant dense<0.000000e+00> : vector<16x1xf32>
    %131 = tpu.matmul %21, %130, %cst_50 {dimension_numbers = #tpu.dot_dimension_numbers<[1], [0], [0], [1], [0, 0, 1, 1], [], []>} : vector<16x32xf32>, vector<32x1xf32>, vector<16x1xf32> -> vector<16x1xf32>
    %132 = vector.broadcast %131 : vector<16x1xf32> to vector<16x8xf32>
    %133 = arith.mulf %108, %132 : vector<16x8xf32>
    %cst_51 = arith.constant dense<0.000000e+00> : vector<8xf32>
    %134 = vector.multi_reduction <add>, %133, %cst_51 [0] : vector<16x8xf32> to vector<8xf32>
    %135 = vector.shape_cast %134 : vector<8xf32> to vector<1x8xf32>
    %c104 = arith.constant 104 : index
    %c0_52 = arith.constant 0 : index
    %136 = vector.load %arg4[%c104, %c0_52] : memref<304x32xf32, #tpu.memory_space<vmem>>, vector<64x16xf32>
    %c168 = arith.constant 168 : index
    %c0_53 = arith.constant 0 : index
    %137 = vector.load %arg4[%c168, %c0_53] : memref<304x32xf32, #tpu.memory_space<vmem>>, vector<1x16xf32>
    %c216 = arith.constant 216 : index
    %c0_54 = arith.constant 0 : index
    %138 = vector.load %arg4[%c216, %c0_54] : memref<304x32xf32, #tpu.memory_space<vmem>>, vector<16x8xf32>
    %c232 = arith.constant 232 : index
    %c0_55 = arith.constant 0 : index
    %139 = vector.load %arg4[%c232, %c0_55] : memref<304x32xf32, #tpu.memory_space<vmem>>, vector<1x8xf32>
    %c240 = arith.constant 240 : index
    %c0_56 = arith.constant 0 : index
    %140 = vector.load %arg4[%c240, %c0_56] : memref<304x32xf32, #tpu.memory_space<vmem>>, vector<8x2xf32>
    %c248 = arith.constant 248 : index
    %c0_57 = arith.constant 0 : index
    %141 = vector.load %arg4[%c248, %c0_57] : memref<304x32xf32, #tpu.memory_space<vmem>>, vector<1x1xf32>
    %cst_58 = arith.constant dense<0.000000e+00> : vector<16xf32>
    %142 = vector.multi_reduction <add>, %38, %cst_58 [1] : vector<16x16xf32> to vector<16xf32>
    %143 = vector.shape_cast %142 : vector<16xf32> to vector<16x1xf32>
    %cst_59 = arith.constant 0.000000e+00 : f32
    %144 = vector.broadcast %cst_59 : f32 to vector<16x1xf32>
    %145 = arith.cmpf ogt, %143, %144 : vector<16x1xf32>
    %cst_60 = arith.constant 1.000000e+00 : f32
    %146 = vector.broadcast %cst_60 : f32 to vector<16x1xf32>
    %147 = arith.maximumf %143, %146 : vector<16x1xf32>
    %cst_61 = arith.constant 1.000000e+00 : f32
    %148 = vector.broadcast %cst_61 : f32 to vector<16x1xf32>
    %149 = arith.divf %148, %147 : vector<16x1xf32>
    %cst_62 = arith.constant 0.000000e+00 : f32
    %150 = vector.broadcast %cst_62 : f32 to vector<16x1xf32>
    %151 = arith.select %145, %149, %150 : vector<16x1xi1>, vector<16x1xf32>
    %cst_63 = arith.constant dense<0.000000e+00> : vector<16x32xf32>
    %152 = tpu.matmul %38, %82, %cst_63 {dimension_numbers = #tpu.dot_dimension_numbers<[1], [0], [0], [1], [0, 0, 1, 1], [], []>} : vector<16x16xf32>, vector<16x32xf32>, vector<16x32xf32> -> vector<16x32xf32>
    %153 = vector.broadcast %151 : vector<16x1xf32> to vector<16x32xf32>
    %154 = arith.mulf %153, %152 : vector<16x32xf32>
    %155 = tpu.concatenate %154, %82 in 1 : vector<16x32xf32>, vector<16x32xf32> -> vector<16x64xf32>
    %cst_64 = arith.constant dense<0.000000e+00> : vector<16x16xf32>
    %156 = tpu.matmul %155, %136, %cst_64 {dimension_numbers = #tpu.dot_dimension_numbers<[1], [0], [0], [1], [0, 0, 1, 1], [], []>} : vector<16x64xf32>, vector<64x16xf32>, vector<16x16xf32> -> vector<16x16xf32>
    %157 = vector.broadcast %137 : vector<1x16xf32> to vector<16x16xf32>
    %158 = arith.addf %156, %157 : vector<16x16xf32>
    %cst_65 = arith.constant dense<0.000000e+00> : vector<16x8xf32>
    %159 = tpu.matmul %158, %138, %cst_65 {dimension_numbers = #tpu.dot_dimension_numbers<[1], [0], [0], [1], [0, 0, 1, 1], [], []>} : vector<16x16xf32>, vector<16x8xf32>, vector<16x8xf32> -> vector<16x8xf32>
    %160 = vector.broadcast %139 : vector<1x8xf32> to vector<16x8xf32>
    %161 = arith.addf %159, %160 : vector<16x8xf32>
    %cst_66 = arith.constant dense<0.000000e+00> : vector<16x2xf32>
    %162 = tpu.matmul %161, %140, %cst_66 {dimension_numbers = #tpu.dot_dimension_numbers<[1], [0], [0], [1], [0, 0, 1, 1], [], []>} : vector<16x8xf32>, vector<8x2xf32>, vector<16x2xf32> -> vector<16x2xf32>
    %163 = tpu.concatenate %29, %33 in 1 : vector<32x16xf32>, vector<32x16xf32> -> vector<32x32xf32>
    %164 = vector.extract_strided_slice %162 {offsets = [0, 0], sizes = [16, 1], strides = [1, 1]} : vector<16x2xf32> to vector<16x1xf32>
    %165 = vector.extract_strided_slice %162 {offsets = [0, 1], sizes = [16, 1], strides = [1, 1]} : vector<16x2xf32> to vector<16x1xf32>
    %166 = tpu.concatenate %164, %165 in 0 : vector<16x1xf32>, vector<16x1xf32> -> vector<32x1xf32>
    %cst_67 = arith.constant dense<0.000000e+00> : vector<32x1xf32>
    %167 = tpu.matmul %163, %166, %cst_67 {dimension_numbers = #tpu.dot_dimension_numbers<[1], [0], [0], [1], [0, 0, 1, 1], [], []>} : vector<32x32xf32>, vector<32x1xf32>, vector<32x1xf32> -> vector<32x1xf32>
    %168 = vector.broadcast %141 : vector<1x1xf32> to vector<32x1xf32>
    %169 = arith.addf %167, %168 : vector<32x1xf32>
    %cst_68 = arith.constant 0.000000e+00 : f32
    %170 = vector.broadcast %cst_68 : f32 to vector<32x1xf32>
    %171 = arith.cmpf ogt, %169, %170 : vector<32x1xf32>
    %cst_69 = arith.constant 2.000000e-01 : f32
    %172 = vector.broadcast %cst_69 : f32 to vector<32x1xf32>
    %173 = arith.mulf %172, %169 : vector<32x1xf32>
    %174 = arith.select %171, %169, %173 : vector<32x1xi1>, vector<32x1xf32>
    %cst_70 = arith.constant dense<0xFF800000> : vector<1xf32>
    %175 = vector.multi_reduction <maximumf>, %174, %cst_70 [0] : vector<32x1xf32> to vector<1xf32>
    %176 = vector.shape_cast %175 : vector<1xf32> to vector<1x1xf32>
    %177 = vector.broadcast %176 : vector<1x1xf32> to vector<32x1xf32>
    %178 = arith.subf %174, %177 : vector<32x1xf32>
    %179 = math.exp %178 : vector<32x1xf32>
    %cst_71 = arith.constant dense<0.000000e+00> : vector<1xf32>
    %180 = vector.multi_reduction <add>, %179, %cst_71 [0] : vector<32x1xf32> to vector<1xf32>
    %181 = vector.shape_cast %180 : vector<1xf32> to vector<1x1xf32>
    %182 = vector.broadcast %181 : vector<1x1xf32> to vector<32x1xf32>
    %183 = arith.divf %179, %182 : vector<32x1xf32>
    %cst_72 = arith.constant dense<0.000000e+00> : vector<16x1xf32>
    %184 = tpu.matmul %37, %183, %cst_72 {dimension_numbers = #tpu.dot_dimension_numbers<[1], [0], [0], [1], [0, 0, 1, 1], [], []>} : vector<16x32xf32>, vector<32x1xf32>, vector<16x1xf32> -> vector<16x1xf32>
    %185 = vector.broadcast %184 : vector<16x1xf32> to vector<16x8xf32>
    %186 = arith.mulf %161, %185 : vector<16x8xf32>
    %cst_73 = arith.constant dense<0.000000e+00> : vector<8xf32>
    %187 = vector.multi_reduction <add>, %186, %cst_73 [0] : vector<16x8xf32> to vector<8xf32>
    %188 = vector.shape_cast %187 : vector<8xf32> to vector<1x8xf32>
    %189 = tpu.concatenate %135, %188 in 0 : vector<1x8xf32>, vector<1x8xf32> -> vector<2x8xf32>
    %cst_74 = arith.constant 0.000000e+00 : f32
    %190 = vector.broadcast %cst_74 : f32 to vector<2x8xf32>
    %191 = arith.maximumf %189, %190 : vector<2x8xf32>
    %c256 = arith.constant 256 : index
    %c0_75 = arith.constant 0 : index
    %192 = vector.load %arg4[%c256, %c0_75] : memref<304x32xf32, #tpu.memory_space<vmem>>, vector<8x8xf32>
    %cst_76 = arith.constant dense<0.000000e+00> : vector<2x8xf32>
    %193 = tpu.matmul %191, %192, %cst_76 {dimension_numbers = #tpu.dot_dimension_numbers<[1], [0], [0], [1], [0, 0, 1, 1], [], []>} : vector<2x8xf32>, vector<8x8xf32>, vector<2x8xf32> -> vector<2x8xf32>
    %c264 = arith.constant 264 : index
    %c0_77 = arith.constant 0 : index
    %194 = vector.load %arg4[%c264, %c0_77] : memref<304x32xf32, #tpu.memory_space<vmem>>, vector<1x8xf32>
    %195 = vector.broadcast %194 : vector<1x8xf32> to vector<2x8xf32>
    %196 = arith.addf %193, %195 : vector<2x8xf32>
    %cst_78 = arith.constant dense<0.000000e+00> : vector<2xf32>
    %197 = vector.multi_reduction <add>, %196, %cst_78 [1] : vector<2x8xf32> to vector<2xf32>
    %198 = vector.shape_cast %197 : vector<2xf32> to vector<2x1xf32>
    %cst_79 = arith.constant 8.000000e+00 : f32
    %199 = vector.broadcast %cst_79 : f32 to vector<2x1xf32>
    %200 = arith.divf %198, %199 : vector<2x1xf32>
    %201 = vector.broadcast %200 : vector<2x1xf32> to vector<2x8xf32>
    %202 = arith.subf %196, %201 : vector<2x8xf32>
    %203 = vector.broadcast %200 : vector<2x1xf32> to vector<2x8xf32>
    %204 = arith.subf %196, %203 : vector<2x8xf32>
    %205 = arith.mulf %202, %204 : vector<2x8xf32>
    %cst_80 = arith.constant dense<0.000000e+00> : vector<2xf32>
    %206 = vector.multi_reduction <add>, %205, %cst_80 [1] : vector<2x8xf32> to vector<2xf32>
    %207 = vector.shape_cast %206 : vector<2xf32> to vector<2x1xf32>
    %cst_81 = arith.constant 8.000000e+00 : f32
    %208 = vector.broadcast %cst_81 : f32 to vector<2x1xf32>
    %209 = arith.divf %207, %208 : vector<2x1xf32>
    %210 = vector.broadcast %200 : vector<2x1xf32> to vector<2x8xf32>
    %211 = arith.subf %196, %210 : vector<2x8xf32>
    %cst_82 = arith.constant 9.99999974E-6 : f32
    %212 = vector.broadcast %cst_82 : f32 to vector<2x1xf32>
    %213 = arith.addf %209, %212 : vector<2x1xf32>
    %214 = math.rsqrt %213 : vector<2x1xf32>
    %215 = vector.broadcast %214 : vector<2x1xf32> to vector<2x8xf32>
    %216 = arith.mulf %211, %215 : vector<2x8xf32>
    %c272 = arith.constant 272 : index
    %c0_83 = arith.constant 0 : index
    %217 = vector.load %arg4[%c272, %c0_83] : memref<304x32xf32, #tpu.memory_space<vmem>>, vector<1x8xf32>
    %218 = vector.broadcast %217 : vector<1x8xf32> to vector<2x8xf32>
    %219 = arith.mulf %216, %218 : vector<2x8xf32>
    %c280 = arith.constant 280 : index
    %c0_84 = arith.constant 0 : index
    %220 = vector.load %arg4[%c280, %c0_84] : memref<304x32xf32, #tpu.memory_space<vmem>>, vector<1x8xf32>
    %221 = vector.broadcast %220 : vector<1x8xf32> to vector<2x8xf32>
    %222 = arith.addf %219, %221 : vector<2x8xf32>
    %c288 = arith.constant 288 : index
    %c0_85 = arith.constant 0 : index
    %223 = vector.load %arg4[%c288, %c0_85] : memref<304x32xf32, #tpu.memory_space<vmem>>, vector<8x4xf32>
    %cst_86 = arith.constant dense<0.000000e+00> : vector<2x4xf32>
    %224 = tpu.matmul %222, %223, %cst_86 {dimension_numbers = #tpu.dot_dimension_numbers<[1], [0], [0], [1], [0, 0, 1, 1], [], []>} : vector<2x8xf32>, vector<8x4xf32>, vector<2x4xf32> -> vector<2x4xf32>
    %c296 = arith.constant 296 : index
    %c0_87 = arith.constant 0 : index
    %225 = vector.load %arg4[%c296, %c0_87] : memref<304x32xf32, #tpu.memory_space<vmem>>, vector<1x4xf32>
    %226 = vector.broadcast %225 : vector<1x4xf32> to vector<2x4xf32>
    %227 = arith.addf %224, %226 : vector<2x4xf32>
    %228 = vector.shape_cast %227 : vector<2x4xf32> to vector<1x2x4xf32>
    %cst_88 = arith.constant dense<0.000000e+00> : vector<1xf32>
    %229 = vector.multi_reduction <add>, %228, %cst_88 [1, 2] : vector<1x2x4xf32> to vector<1xf32>
    %230 = vector.shape_cast %229 : vector<1xf32> to vector<1x1x1xf32>
    %231 = vector.extract %230[0, 0, 0] : f32 from vector<1x1x1xf32>
    %232 = vector.broadcast %231 : f32 to vector<1x1xf32>
    %cst_89 = arith.constant 1.250000e-01 : f32
    %233 = vector.broadcast %cst_89 : f32 to vector<1x1xf32>
    %234 = arith.mulf %232, %233 : vector<1x1xf32>
    %c0_90 = arith.constant 0 : index
    %c0_91 = arith.constant 0 : index
    %235 = vector.load %arg5[%c0_90, %c0_91] : memref<1x1xf32, #tpu.memory_space<vmem>>, vector<1x1xf32>
    tpu.vector_store %arg5[%c0_90, %c0_91], %234 {strides = array<i32>} : memref<1x1xf32, #tpu.memory_space<vmem>>, vector<1x1xf32>,
    return
  }
}

</mosaic_0001>

<bundles_post_ra>
// kernel: forward.1
= control target key start
LH: loop header
LB: loop body
LE: loop exit
PB: predicated region body
PF: predicated region fallthrough
CT: control target
= control target key end

     0   :  { %v1465_v2 = vmov 0   ;;  %v1466_v3 = vmov 2   ;;  %s1977_s0 = inlined_call_operand.vmem [shape: s32[4,32], index: 0, kind: input, shape index: {}]   ;;  %s1978_s1 = inlined_call_operand.vmem [shape: s32[32,4], index: 1, kind: input, shape index: {}]   ;;  %s1979_s2 = inlined_call_operand.vmem [shape: f32[16,8], index: 2, kind: input, shape index: {}]   ;;  %s1980_s3 = inlined_call_operand.vmem [shape: f32[16,8], index: 3, kind: input, shape index: {}]   ;;  %s1981_s4 = inlined_call_operand.vmem [shape: f32[304,32], index: 4, kind: input, shape index: {}]   ;;  %s1982_s5 = inlined_call_operand.hbm [shape: f32[1,1], index: 5, kind: output, shape index: {}]  }
   0x1   :  { %v1509_v0 = vld [vmem:[%s1978_s1 + $0x18] sm:$0xff]  ;;  %v1514_v1 = vld [vmem:[%s1978_s1 + $0x8] sm:$0xff]  ;;  %1363 = vset.pattern.permute.xlu1 %v1465_v2  ;;  %1362 = vset.pattern.permute.xlu0 %v1465_v2 }
   0x2   :  { %47 = vperm.xlu0 %1362, %v1509_v0   ;;  %41 = vperm.xlu1 %1363, %v1514_v1  }
   0x3   :  { %1364 = vset.pattern.permute.xlu2 %v1466_v3 }
   0x4   :  { %133 = vperm.xlu2 %1364, %v1509_v0  }
   0x5   :  { %10 = vsyncpa [#allocation3], 0  ;;  %v1524_v4 = vld [vmem:[%s1978_s1 + $0x10] sm:$0xff]  ;;  %v1529_v5 = vld [vmem:[%s1978_s1] sm:$0xff]  ;;  %v21_v7 = vlaneseq  ;;  %v1467_v10 = vmov 1.0   ;;  %v1468_v17 = vmov 0.0  }
   0x6   :  { %v1385_v14 = vld [vmem:[%s1977_s0 + $0x1] ss:$0 sm:$0xff]  ;;  %vm92_vm6 = vcmask 261120   ;;  %v1386_v19 = vld [vmem:[%s1977_s0 + $0x3] ss:$0 sm:$0xff]  ;;  %v1469_v26 = vmov 1  }
   0x7   :  { %v1538_v8 = vand.u32 127, %v21_v7  ;;  %v22_v13 = vshrl.u32 %v21_v7, 7  ;;  %vm213_vm14 = vcmask 130048   ;;  %v208_v59 = vld [vmem:[%s1979_s2 + $0x8] sm:$0xff]  ;;  %v207_v62 = vld [vmem:[%s1979_s2] sm:$0xff]  ;;  %s1470_s7 = smov 16  }
   0x8   :  { %s1472_s22 = smov 32   ;;  %s1473_s6 = smov 127  }
   0x9   :  { %vm86_vm4 = vcmp.eq.s32.totalorder %v22_v13, %v1385_v14  ;;  %v23_v20 = vadd.s32 8, %v22_v13  ;;  %vm172_vm8 = vcmp.eq.s32.totalorder %v22_v13, %v1386_v19  ;;  %vm26_vm13 = vcmp.eq.s32.totalorder %v22_v13, %v1538_v8  ;;  %s1475_s29 = smov [#allocation2]   ;;  %s1266_s8 = sshll.u32 %s1982_s5, 4  ;;  %s1267_s8 = int_to_ptr.hbm [resolvable:$true] %s1266_s8 }
   0xa   :  { %44 = vperm.xlu0 %1362, %v1524_v4   ;;  %38 = vperm.xlu1 %1363, %v1529_v5   ;;  %v1579_v18 = vsel %vm86_vm4, 1.0, %v1468_v17  ;;  %v1603_v23 = vsel %vm172_vm8, 1.0, %v1468_v17  ;;  %v1275_v27 = vsel %vm26_vm13, 1.0, %v1468_v17  ;;  %s1264_s30 = sshll.u32 %s1475_s29, 4  ;;  %s1265_s30 = int_to_ptr.vmem [resolvable:$true] %s1264_s30 }
   0xb   :  { %vm87_vm9 = vcmp.eq.s32.totalorder %v23_v20, %v1385_v14  ;;  %vm173_vm12 = vcmp.eq.s32.totalorder %v23_v20, %v1386_v19  ;;  %vm27_vm15 = vcmp.eq.s32.totalorder %v23_v20, %v1538_v8 }
   0xc   :  { %130 = vperm.xlu2 %1364, %v1524_v4   ;;  %v1606_v24 = vsel %vm87_vm9, 1.0, %v1468_v17  ;;  %v1616_v25 = vsel %vm173_vm12, 1.0, %v1468_v17  ;;  %v1276_v31 = vsel %vm27_vm15, 1.0, %v1468_v17 }
  0x12   :  { %1365 = vset.pattern.permute.xlu0 %v1466_v3  ;;  %1366 = vset.pattern.permute.xlu1 %v1466_v3 }
  0x13   :  { %127 = vperm.xlu0 %1365, %v1514_v1   ;;  %124 = vperm.xlu1 %1366, %v1529_v5  }
  0x14   :  { %1369 = vset.pattern.permute.xlu2 %v1469_v26 }
  0x1b   :  { %1367 = vset.pattern.permute.xlu1 %v1469_v26  ;;  %1368 = vset.pattern.permute.xlu0 %v1469_v26 }
  0x5e   :  { %v1536_v6 = vpop.permute.xlu2 %133 }
  0x5f   :  { %vm1983_vm0 = vcmp.eq.s32.totalorder %v1538_v8, %v1536_v6 }
  0x60   :  { %1303 = vmatpush.msk.msra.mxu1 %vm1983_vm0, %v1467_v10 }
  0x66   :  { %v1540_v9 = vpop.permute.xlu2 %130 }
  0x67   :  { %vm1984_vm1 = vcmp.eq.s32.totalorder %v1538_v8, %v1540_v9 }
  0x68   :  { %1304 = vmatpush.msk.msra.mxu1 %vm1984_vm1, %v1467_v10 }
  0x74   :  { %v1552_v11 = vpop.permute.xlu0 %47  ;;  %v1554_v12 = vpop.permute.xlu1 %41 }
  0x75   :  { %vm52_vm2 = vcmp.eq.s32.totalorder %v1538_v8, %v1552_v11  ;;  %vm50_vm5 = vcmp.eq.s32.totalorder %v1538_v8, %v1554_v12  ;;  %v792_v12 = vld [vmem:[%s1981_s4 + $0xa0] sm:$0xff] }
  0x76   :  { %1287 = vmatpush.msk.msra.mxu0 %vm52_vm2, %v1467_v10 }
  0x7c   :  { %v1564_v15 = vpop.permute.xlu0 %44  ;;  %v1568_v16 = vpop.permute.xlu1 %38 }
  0x7d   :  { %vm51_vm3 = vcmp.eq.s32.totalorder %v1538_v8, %v1564_v15  ;;  %vm49_vm7 = vcmp.eq.s32.totalorder %v1538_v8, %v1568_v16  ;;  %v310_v16 = vld [vmem:[%s1981_s4 + $0x10] sm:$0xff] }
  0x7e   :  { %1288 = vmatpush.msk.msra.mxu0 %vm51_vm3, %v1467_v10 }
  0x80   :  { %1289 = vmatpush.msk.msra.mxu0 %vm50_vm5, %v1467_v10 }
  0x82   :  { %1290 = vmatpush.msk.msra.mxu0 %vm49_vm7, %v1467_v10 }
  0x83   :  { %1291 = vmatmul.msk.f32.vlgmr.msra.gmra.mxu0 %vm92_vm6, %v1579_v18 }
  0x85   :  { %v1591_v21 = vpop.permute.xlu0 %127  ;;  %v1593_v22 = vpop.permute.xlu1 %124 }
  0x86   :  { %vm136_vm10 = vcmp.eq.s32.totalorder %v1538_v8, %v1591_v21  ;;  %vm135_vm11 = vcmp.eq.s32.totalorder %v1538_v8, %v1593_v22 }
  0x87   :  { %1305 = vmatpush.msk.msra.mxu1 %vm136_vm10, %v1467_v10 }
  0x89   :  { %1306 = vmatpush.msk.msra.mxu1 %vm135_vm11, %v1467_v10 }
  0x8a   :  { %1307 = vmatmul.msk.f32.vlgmr.msra.gmra.mxu1 %vm92_vm6, %v1603_v23 }
  0x8b   :  { %1292 = vmatmul.msk.f32.gmra.mxu0 %vm92_vm6, %v1606_v24 }
  0x92   :  { %1308 = vmatmul.msk.f32.gmra.mxu1 %vm92_vm6, %v1616_v25 }
 0x100   :  { %v1622_v28 = vpop.f32.mrf.mxu0 }
 0x101   :  { %v1625_v29 = vadd.f32 %v1275_v27, %v1622_v28  ;;  %v429_v39 = vsel %vm213_vm14, %v1622_v28, 0.0 }
 0x103   :  { %v214_v30 = vsel %vm213_vm14, %v1625_v29, 0.0 }
 0x104   :  { %215 = vadd.xlane.f32.xlu1 %v214_v30 }
 0x107   :  { %v1634_v34 = vpop.f32.mrf.mxu1 }
 0x108   :  { %v1631_v32 = vpop.f32.mrf.mxu0  ;;  %v1640_v37 = vadd.f32 %v1275_v27, %v1634_v34 }
 0x109   :  { %v212_v33 = vadd.f32 %v1276_v31, %v1631_v32  ;;  %v432_v35 = vsel %vm213_vm14, %v1631_v32, 0.0 }
 0x10a   :  { %v314_v38 = vsel %vm213_vm14, %v1640_v37, 0.0 }
 0x10b   :  { %v217_v36 = vsel %vm213_vm14, %v212_v33, 0.0 }
 0x10c   :  { %433 = vadd.xlane.f32.xlu1 %v432_v35  ;;  %218 = vadd.xlane.f32.xlu2 %v217_v36 }
 0x10f   :  { %v1648_v40 = vpop.f32.mrf.mxu1 }
 0x110   :  { %v1651_v41 = vadd.f32 %v1276_v31, %v1648_v40 }
 0x112   :  { %v317_v42 = vsel %vm213_vm14, %v1651_v41, 0.0 }
 0x113   :  { %318 = vadd.xlane.f32.xlu0 %v317_v42 }
 0x114   :  { %315 = vadd.xlane.f32.xlu2 %v314_v38 }
 0x11c   :  { %430 = vadd.xlane.f32.xlu2 %v429_v39 }
 0x125   :  { %62 = vperm.xlu1 %1367, %v1529_v5  }
 0x12d   :  { %71 = vperm.xlu1 %1367, %v1509_v0  }
 0x177   :  { %v216_v43 = vpop.xlane.xlu1 %215 }
 0x178   :  { %1399 = vrsqrt.f32 %v216_v43  ;;  %vm228_vm8 = vweird.f32 %v216_v43  ;;  %vm220_vm1 = vcmp.gt.f32.partialorder %v216_v43, 0.0 }
 0x17e   :  { %v1400_v44 = vpop.eup %1399 }
 0x17f   :  { %v223_v45 = vmul.f32 %v1400_v44, %v216_v43  ;;  %v219_v46 = vpop.xlane.xlu2 %218  ;;  %vm229_vm4 = vweird.f32 %v1400_v44  ;;  %v1655_v56 = vpop.xlane.xlu1 %433 }
 0x180   :  { %1401 = vrsqrt.f32 %v219_v46  ;;  %vm230_vm12 = vmor %vm228_vm8, %vm229_vm4  ;;  %vm238_vm13 = vweird.f32 %v219_v46  ;;  %vm221_vm0 = vcmp.gt.f32.partialorder %v219_v46, 0.0 }
 0x181   :  { %v224_v47 = vmul.f32 %v1400_v44, %v223_v45 }
 0x183   :  { %v225_v48 = vmul.f32 0.5, %v224_v47  ;;  %v309_v47 = vld [vmem:[%s1980_s3 + $0x8] sm:$0xff] }
 0x185   :  { %v226_v50 = vsub.f32 1.5, %v225_v48 }
 0x186   :  { %v1402_v49 = vpop.eup %1401  ;;  %v319_v27 = vpop.xlane.xlu0 %318 }
 0x187   :  { %v233_v51 = vmul.f32 %v1402_v49, %v219_v46  ;;  %v227_v54 = vmul.f32 %v1400_v44, %v226_v50  ;;  %vm239_vm9 = vweird.f32 %v1402_v49  ;;  %v316_v20 = vpop.xlane.xlu2 %315  ;;  %v209_v46 = vld [vmem:[%s1981_s4] sm:$0xff] }
 0x188   :  { %vm240_vm15 = vmor %vm238_vm13, %vm239_vm9  ;;  %1403 = vrsqrt.f32 %v316_v20  ;;  %vm328_vm9 = vweird.f32 %v316_v20  ;;  %v308_v50 = vld [vmem:[%s1980_s3] sm:$0xff] }
 0x189   :  { %v234_v52 = vmul.f32 %v1402_v49, %v233_v51  ;;  %v231_v58 = vsel %vm230_vm12, %v1400_v44, %v227_v54  ;;  %1405 = vrsqrt.f32 %v319_v27  ;;  %v1277_v54 = vsel %vm49_vm7, 1.0, %v1468_v17 }
 0x18a   :  { %v242_v63 = vsel %vm220_vm1, %v231_v58, 0.0  ;;  %vm338_vm1 = vweird.f32 %v319_v27 }
 0x18b   :  { %v235_v53 = vmul.f32 0.5, %v234_v52  ;;  %v244_v7 = vmul.f32 %v242_v63, %v207_v62 }
 0x18d   :  { %v236_v55 = vsub.f32 1.5, %v235_v53 }
 0x18e   :  { %v1404_v26 = vpop.eup %1403 }
 0x18f   :  { %v237_v57 = vmul.f32 %v1402_v49, %v236_v55  ;;  %v1406_v30 = vpop.eup %1405  ;;  %vm329_vm12 = vweird.f32 %v1404_v26 }
 0x190   :  { %vm339_vm8 = vweird.f32 %v1406_v30 }
 0x191   :  { %v241_v60 = vsel %vm240_vm15, %v1402_v49, %v237_v57  ;;  %vm340_vm13 = vmor %vm338_vm1, %vm339_vm8  ;;  %vm321_vm15 = vcmp.gt.f32.partialorder %v319_v27, 0.0  ;;  %vm278_vm1 = vcmask 64512  }
 0x192   :  { %v1660_v61 = vsel %vm221_vm0, %v241_v60, 0.0 }
 0x193   :  { %v245_v3 = vmul.f32 %v1660_v61, %v208_v59 }
 0x195   :  { %266 = vmatpush.msra.mxu2 %v245_v3  ;;  %1347 = vmatpush.msra.mxu3 %v245_v3 }
 0x197   :  { %v63_v10 = vpop.permute.xlu1 %62  ;;  %267 = vmatpush.msra.mxu2 %v244_v7  ;;  %1348 = vmatpush.msra.mxu3 %v244_v7 }
 0x198   :  { %vm73_vm4 = vcmp.eq.s32.totalorder %v1538_v8, %v63_v10  ;;  %1309 = vmatmul.msk.f32.vlgmr.msra.gmra.mxu2 %vm213_vm14, %v1625_v29  ;;  %1310 = vmatmul.msk.f32.vlgmr.msra.gmra.mxu3 %vm213_vm14, %v212_v33  ;;  %v323_v29 = vmul.f32 %v1404_v26, %v316_v20  ;;  %v333_v33 = vmul.f32 %v1406_v30, %v319_v27 }
 0x199   :  { %v1281_v13 = vsel %vm73_vm4, 1.0, %v1468_v17  ;;  %vm330_vm4 = vmor %vm328_vm9, %vm329_vm12  ;;  %300 = vmatpush.msrb.mxu3 %v209_v46  ;;  %399 = vmatpush.msrb.mxu2 %v310_v16  ;;  %v418_v46 = vld [vmem:[%s1981_s4 + $0x38] sm:$0xff] }
 0x19a   :  { %606 = vrot.lane.b32.xlu1 %v1281_v13, %s1470_s7  ;;  %v324_v31 = vmul.f32 %v1404_v26, %v323_v29  ;;  %v334_v35 = vmul.f32 %v1406_v30, %v333_v33 }
 0x19c   :  { %v325_v36 = vmul.f32 0.5, %v324_v31  ;;  %v335_v38 = vmul.f32 0.5, %v334_v35 }
 0x19e   :  { %v336_v39 = vsub.f32 1.5, %v335_v38  ;;  %v326_v42 = vsub.f32 1.5, %v325_v36 }
 0x19f   :  { %v72_v14 = vpop.permute.xlu1 %71 }
 0x1a0   :  { %vm76_vm0 = vcmp.eq.s32.totalorder %v1538_v8, %v72_v14  ;;  %v337_v43 = vmul.f32 %v1406_v30, %v336_v39  ;;  %v327_v48 = vmul.f32 %v1404_v26, %v326_v42  ;;  %v1471_v14 = vmov 3  }
 0x1a1   :  { %v1284_v19 = vsel %vm76_vm0, 1.0, %v1468_v17  ;;  %vm320_vm0 = vcmp.gt.f32.partialorder %v316_v20, 0.0  ;;  %1375 = vset.pattern.permute.xlu1 %v1471_v14  ;;  %v1388_v20 = vld [vmem:[%s1981_s4 + $0x18] ss:$0 sm:$0xff] }
 0x1a2   :  { %612 = vrot.lane.b32.xlu1 %v1284_v19, %s1470_s7  ;;  %v341_v44 = vsel %vm340_vm13, %v1406_v30, %v337_v43  ;;  %v331_v51 = vsel %vm330_vm4, %v1404_v26, %v327_v48  ;;  %v1387_v19 = vld [vmem:[%s1981_s4 + $0x8] ss:$0 sm:$0xff]  ;;  %v417_v48 = vld [vmem:[%s1981_s4 + $0x30] sm:$0xff] }
 0x1a3   :  { %v343_v45 = vsel %vm321_vm15, %v341_v44, 0.0  ;;  %v342_v52 = vsel %vm320_vm0, %v331_v51, 0.0  ;;  %v415_v51 = vld [vmem:[%s1981_s4 + $0x20] sm:$0xff] }
 0x1a4   :  { %v345_v49 = vmul.f32 %v343_v45, %v309_v47  ;;  %v344_v53 = vmul.f32 %v342_v52, %v308_v50 }
 0x1a6   :  { %366 = vmatpush.msra.mxu3 %v345_v49  ;;  %v416_v49 = vld [vmem:[%s1981_s4 + $0x28] sm:$0xff] }
 0x1a8   :  { %367 = vmatpush.msra.mxu3 %v344_v53 }
 0x20c   :  { %v607_v55 = vpop.permute.xlu1 %606 }
 0x20d   :  { %v1689_v57 = vsel %vm213_vm14, %v1277_v54, %v607_v55 }
 0x214   :  { %v1747_v50 = vpop.permute.xlu1 %612 }
 0x21b   :  { %v269_v58 = vpop.f32.mrf.mxu2  ;;  %v272_v60 = vpop.f32.mrf.mxu3 }
 0x21c   :  { %v275_v59 = vmul.f32 %v269_v58, %v242_v63  ;;  %v276_v62 = vmul.f32 %v272_v60, %v1660_v61 }
 0x21e   :  { %1311 = vmatmul.msk.f32.vlgmr.msrb.gmra.mxu3 %vm278_vm1, %v275_v59 }
 0x226   :  { %1312 = vmatmul.msk.f32.gmra.mxu3 %vm278_vm1, %v276_v62 }
 0x22e   :  { %1313 = vmatmul.msk.f32.vlgmr.msra.gmra.mxu3 %vm213_vm14, %v1640_v37  ;;  %v425_v37 = vld [vmem:[%s1981_s4 + $0xb8] sm:$0xff] }
 0x22f   :  { %564 = vmatpush.msrb.mxu3 %v425_v37 }
 0x236   :  { %1314 = vmatmul.msk.f32.gmra.mxu3 %vm213_vm14, %v1651_v41  ;;  %v424_v41 = vld [vmem:[%s1981_s4 + $0xb0] sm:$0xff] }
 0x237   :  { %565 = vmatpush.msrb.mxu3 %v424_v41 }
 0x2a1   :  { %v302_v3 = vpop.f32.mrf.mxu3 }
 0x2a2   :  { %v303_v26 = vadd.f32 %v1387_v19, %v302_v3 }
 0x2a4   :  { %v407_v30 = vmax.f32 %v303_v26, 0.0 }
 0x2a9   :  { %v305_v63 = vpop.f32.mrf.mxu3 }
 0x2aa   :  { %v306_v36 = vadd.f32 %v1387_v19, %v305_v63 }
 0x2ac   :  { %v408_v42 = vmax.f32 %v306_v36, 0.0 }
 0x2b1   :  { %v369_v7 = vpop.f32.mrf.mxu3 }
 0x2b2   :  { %v375_v10 = vmul.f32 %v369_v7, %v342_v52  ;;  %v438_v52 = vmax.f32 %v1655_v56, 1.0 }
 0x2b4   :  { %1315 = vmatmul.msk.f32.vlgmr.msrb.gmra.mxu2 %vm278_vm1, %v375_v10 }
 0x2b9   :  { %v372_v61 = vpop.f32.mrf.mxu3 }
 0x2ba   :  { %v376_v13 = vmul.f32 %v372_v61, %v343_v45 }
 0x2bc   :  { %1316 = vmatmul.msk.f32.gmra.mxu2 %vm278_vm1, %v376_v13 }
 0x337   :  { %v401_v27 = vpop.f32.mrf.mxu2 }
 0x338   :  { %v402_v29 = vadd.f32 %v1388_v20, %v401_v27 }
 0x33a   :  { %v409_v31 = vmax.f32 %v402_v29, 0.0 }
 0x33c   :  { %v413_v33 = vadd.f32 %v409_v31, %v402_v29  ;;  %v411_v35 = vadd.f32 %v409_v31, %v407_v30  ;;  %v465_v30 = vand.u32 2147483648, %v438_v52 }
 0x33e   :  { %874 = vrot.lane.b32.xlu1 %v413_v33, %s1472_s22  ;;  %504 = vrot.lane.b32.xlu2 %v411_v35, %s1472_s22 }
 0x33f   :  { %v404_v38 = vpop.f32.mrf.mxu2 }
 0x340   :  { %v405_v39 = vadd.f32 %v1388_v20, %v404_v38 }
 0x342   :  { %v410_v43 = vmax.f32 %v405_v39, 0.0 }
 0x344   :  { %v414_v44 = vadd.f32 %v410_v43, %v405_v39  ;;  %v412_v45 = vadd.f32 %v410_v43, %v408_v42 }
 0x346   :  { %876 = vrot.lane.b32.xlu1 %v414_v44, %s1472_s22  ;;  %861 = vmatpush.msra.mxu3 %v414_v44 }
 0x347   :  { %506 = vrot.lane.b32.xlu0 %v412_v45, %s1472_s22  ;;  %491 = vmatpush.msrb.mxu0 %v412_v45  ;;  %v466_v45 = vor.u32 1.1754944e-38, %v465_v30 }
 0x348   :  { %862 = vmatpush.msra.mxu3 %v413_v33  ;;  %68 = vperm.xlu2 %1369, %v1524_v4  }
 0x349   :  { %492 = vmatpush.msrb.mxu0 %v411_v35  ;;  %v463_v35 = vand.u32 2147483647, %v438_v52 }
 0x34a   :  { %1317 = vmatmul.msk.f32.vlgmr.msrb.gmra.mxu0 %vm213_vm14, %v1622_v28  ;;  %v422_v28 = vld [vmem:[%s1981_s4 + $0x58] sm:$0xff] }
 0x34b   :  { %528 = vmatpush.msrb.mxu1 %v422_v28 }
 0x34e   :  { %148 = vperm.xlu1 %1375, %v1529_v5   ;;  %v421_v5 = vld [vmem:[%s1981_s4 + $0x50] sm:$0xff] }
 0x34f   :  { %65 = vperm.xlu0 %1368, %v1514_v1   ;;  %529 = vmatpush.msrb.mxu1 %v421_v5 }
 0x350   :  { %1383 = vset.pattern.permute.xlu2 %v1465_v2 }
 0x352   :  { %1318 = vmatmul.msk.f32.gmra.mxu0 %vm213_vm14, %v1631_v32  ;;  %v420_v32 = vld [vmem:[%s1981_s4 + $0x48] sm:$0xff] }
 0x353   :  { %530 = vmatpush.msrb.mxu1 %v420_v32 }
 0x356   :  { %151 = vperm.xlu1 %1375, %v1514_v1   ;;  %v431_v1 = vpop.xlane.xlu2 %430 }
 0x357   :  { %1376 = vset.pattern.permute.xlu0 %v1471_v14  ;;  %v437_v47 = vmax.f32 %v431_v1, 1.0  ;;  %vm435_vm0 = vcmp.gt.f32.partialorder %v431_v1, 0.0 }
 0x359   :  { %1407 = vrcp.f32 %v437_v47  ;;  %v450_v10 = vand.u32 2147483648, %v437_v47  ;;  %vm444_vm8 = vweird.f32 %v437_v47  ;;  %v448_v61 = vand.u32 2147483647, %v437_v47 }
 0x35a   :  { %1409 = vrcp.f32 %v438_v52 }
 0x35b   :  { %v451_v20 = vor.u32 1.1754944e-38, %v450_v10  ;;  %vm449_vm15 = vcmp.eq.f32.partialorder %v448_v61, 8.507059e+37  ;;  %v786_v10 = vld [vmem:[%s1981_s4 + $0x70] sm:$0xff]  ;;  %v785_v61 = vld [vmem:[%s1981_s4 + $0x68] sm:$0xff] }
 0x35e   :  { %154 = vperm.xlu1 %1375, %v1524_v4   ;;  %v419_v4 = vld [vmem:[%s1981_s4 + $0x40] sm:$0xff] }
 0x35f   :  { %531 = vmatpush.msrb.mxu1 %v419_v4  ;;  %v1408_v53 = vpop.eup %1407 }
 0x360   :  { %v440_v55 = vmul.f32 %v1408_v53, %v437_v47  ;;  %v1410_v59 = vpop.eup %1409  ;;  %vm445_vm7 = vweird.f32 %v1408_v53 }
 0x361   :  { %532 = vmatpush.msrb.mxu1 %v418_v46  ;;  %v455_v3 = vmul.f32 %v1410_v59, %v438_v52  ;;  %vm446_vm9 = vmor %vm444_vm8, %vm445_vm7  ;;  %vm460_vm4 = vweird.f32 %v1410_v59  ;;  %vm459_vm7 = vweird.f32 %v438_v52  ;;  %vm513_vm8 = vcmask 523264   ;;  %v1389_v52 = vld [vmem:[%s1981_s4 + $0x60] ss:$0 sm:$0xff] }
 0x362   :  { %v441_v58 = vsub.f32 1.0, %v440_v55 }
 0x363   :  { %533 = vmatpush.msrb.mxu1 %v417_v48  ;;  %v456_v7 = vsub.f32 1.0, %v455_v3  ;;  %v799_v48 = vsel %vm213_vm14, %v1634_v34, 0.0  ;;  %v788_v3 = vld [vmem:[%s1981_s4 + $0x80] sm:$0xff] }
 0x364   :  { %v442_v16 = vmul.f32 %v1408_v53, %v441_v58 }
 0x365   :  { %534 = vmatpush.msrb.mxu1 %v416_v49  ;;  %v457_v14 = vmul.f32 %v1410_v59, %v456_v7 }
 0x366   :  { %1382 = vset.pattern.permute.xlu1 %v1465_v2  ;;  %v443_v63 = vadd.f32 %v1408_v53, %v442_v16  ;;  %v789_v16 = vld [vmem:[%s1981_s4 + $0x88] sm:$0xff] }
 0x367   :  { %535 = vmatpush.msrb.mxu1 %v415_v51  ;;  %v458_v29 = vadd.f32 %v1410_v59, %v457_v14 }
 0x368   :  { %v447_v41 = vsel %vm446_vm9, %v1408_v53, %v443_v63  ;;  %vm461_vm9 = vmor %vm459_vm7, %vm460_vm4  ;;  %v787_v63 = vld [vmem:[%s1981_s4 + $0x78] sm:$0xff] }
 0x369   :  { %v452_v27 = vsel %vm449_vm15, %v451_v20, %v447_v41  ;;  %v462_v42 = vsel %vm461_vm9, %v1410_v59, %v458_v29  ;;  %vm436_vm15 = vcmp.gt.f32.partialorder %v1655_v56, 0.0  ;;  %v1278_v56 = vsel %vm50_vm5, 1.0, %v1468_v17  ;;  %v791_v59 = vld [vmem:[%s1981_s4 + $0x98] sm:$0xff]  ;;  %v1390_v41 = vld [vmem:[%s1981_s4 + $0xc0] ss:$0 sm:$0xff] }
 0x36a   :  { %v469_v31 = vsel %vm435_vm0, %v452_v27, 0.0 }
 0x398   :  { %v505_v39 = vpop.permute.xlu2 %504 }
 0x3b0   :  { %v1753_v54 = vpop.permute.xlu1 %874 }
 0x3b8   :  { %v1755_v60 = vpop.permute.xlu1 %876 }
 0x3b9   :  { %v507_v62 = vpop.permute.xlu0 %506 }
 0x3c0   :  { %v149_v13 = vpop.permute.xlu1 %148 }
 0x3c1   :  { %vm159_vm12 = vcmp.eq.s32.totalorder %v1538_v8, %v149_v13  ;;  %v66_v37 = vpop.permute.xlu0 %65 }
 0x3c2   :  { %v1297_v19 = vsel %vm159_vm12, 1.0, %v1468_v17  ;;  %vm74_vm13 = vcmp.eq.s32.totalorder %v1538_v8, %v66_v37 }
 0x3c3   :  { %v1282_v26 = vsel %vm74_vm13, 1.0, %v1468_v17  ;;  %975 = vrot.lane.b32.xlu1 %v1297_v19, %s1470_s7  ;;  %vm464_vm13 = vcmp.eq.f32.partialorder %v463_v35, 8.507059e+37 }
 0x3c4   :  { %608 = vrot.lane.b32.xlu0 %v1282_v26, %s1470_s7  ;;  %v467_v28 = vsel %vm464_vm13, %v466_v45, %v462_v42 }
 0x3c5   :  { %v470_v5 = vsel %vm436_vm15, %v467_v28, 0.0 }
 0x3c7   :  { %v494_v33 = vpop.f32.mrf.mxu0 }
 0x3c8   :  { %v500_v36 = vmul.f32 %v494_v33, %v469_v31  ;;  %v152_v38 = vpop.permute.xlu1 %151 }
 0x3c9   :  { %vm160_vm12 = vcmp.eq.s32.totalorder %v1538_v8, %v152_v38 }
 0x3ca   :  { %v1298_v43 = vsel %vm160_vm12, 1.0, %v1468_v17  ;;  %v510_v44 = vsel %vm92_vm6, %v500_v36, %v505_v39 }
 0x3cb   :  { %1319 = vmatmul.msk.f32.vlgmr.msrb.gmra.mxu1 %vm513_vm8, %v510_v44  ;;  %977 = vrot.lane.b32.xlu1 %v1298_v43, %s1470_s7 }
 0x3cf   :  { %v497_v32 = vpop.f32.mrf.mxu0 }
 0x3d0   :  { %v501_v1 = vmul.f32 %v497_v32, %v470_v5  ;;  %v155_v4 = vpop.permute.xlu1 %154  ;;  %v69_v32 = vpop.permute.xlu2 %68 }
 0x3d1   :  { %vm161_vm4 = vcmp.eq.s32.totalorder %v1538_v8, %v155_v4  ;;  %vm75_vm13 = vcmp.eq.s32.totalorder %v1538_v8, %v69_v32  ;;  %v802_v4 = vsel %vm213_vm14, %v1648_v40, 0.0 }
 0x3d2   :  { %v1299_v46 = vsel %vm161_vm4, 1.0, %v1468_v17  ;;  %v511_v47 = vsel %vm92_vm6, %v501_v1, %v507_v62  ;;  %v1283_v1 = vsel %vm75_vm13, 1.0, %v1468_v17 }
 0x3d3   :  { %1320 = vmatmul.msk.f32.gmra.mxu1 %vm513_vm8, %v511_v47  ;;  %979 = vrot.lane.b32.xlu1 %v1299_v46, %s1470_s7 }
 0x3ee   :  { %800 = vadd.xlane.f32.xlu0 %v799_v48 }
 0x402   :  { %157 = vperm.xlu0 %1376, %v1509_v0  }
 0x40a   :  { %1384 = vset.pattern.permute.xlu0 %v1465_v2  ;;  %v427_v2 = vld [vmem:[%s1981_s4 + $0xc8] sm:$0xff] }
 0x40b   :  { %594 = vmatpush.msra.mxu2 %v427_v2 }
 0x40d   :  { %897 = vmatpush.msrb.mxu2 %v792_v12 }
 0x40f   :  { %898 = vmatpush.msrb.mxu2 %v791_v59 }
 0x436   :  { %v609_v49 = vpop.permute.xlu0 %608 }
 0x437   :  { %v1783_v51 = vsel %vm213_vm14, %v1278_v56, %v609_v49  ;;  %v1280_v49 = vsel %vm52_vm2, 1.0, %v1468_v17 }
 0x448   :  { %v537_v53 = vpop.f32.mrf.mxu1 }
 0x449   :  { %v538_v55 = vadd.f32 %v1389_v52, %v537_v53 }
 0x44b   :  { %1321 = vmatmul.msk.f32.vlgmr.msrb.gmra.mxu3 %vm213_vm14, %v538_v55 }
 0x450   :  { %v540_v0 = vpop.f32.mrf.mxu1 }
 0x451   :  { %v541_v58 = vadd.f32 %v1389_v52, %v540_v0 }
 0x453   :  { %1322 = vmatmul.msk.f32.gmra.mxu3 %vm213_vm14, %v541_v58 }
 0x45b   :  { %1331 = vmatmul.msk.f32.vlgmr.msra.gmra.mxu3 %vm213_vm14, %v1634_v34  ;;  %v790_v34 = vld [vmem:[%s1981_s4 + $0x90] sm:$0xff] }
 0x45c   :  { %899 = vmatpush.msrb.mxu2 %v790_v34 }
 0x45e   :  { %900 = vmatpush.msrb.mxu2 %v789_v16 }
 0x460   :  { %901 = vmatpush.msrb.mxu2 %v788_v3 }
 0x461   :  { %v801_v62 = vpop.xlane.xlu0 %800 }
 0x462   :  { %v807_v7 = vmax.f32 %v801_v62, 1.0  ;;  %902 = vmatpush.msrb.mxu2 %v787_v63  ;;  %vm805_vm12 = vcmp.gt.f32.partialorder %v801_v62, 0.0 }
 0x463   :  { %1332 = vmatmul.msk.f32.gmra.mxu3 %vm213_vm14, %v1648_v40  ;;  %v1279_v40 = vsel %vm51_vm3, 1.0, %v1468_v17 }
 0x464   :  { %1411 = vrcp.f32 %v807_v7  ;;  %903 = vmatpush.msrb.mxu2 %v786_v10  ;;  %v820_v29 = vand.u32 2147483648, %v807_v7  ;;  %vm814_vm0 = vweird.f32 %v807_v7  ;;  %v818_v31 = vand.u32 2147483647, %v807_v7  ;;  %v1392_v10 = vld [vmem:[%s1981_s4 + $0xd0] ss:$0 sm:$0xff] }
 0x466   :  { %904 = vmatpush.msrb.mxu2 %v785_v61  ;;  %v821_v36 = vor.u32 1.1754944e-38, %v820_v29  ;;  %vm819_vm9 = vcmp.eq.f32.partialorder %v818_v31, 8.507059e+37 }
 0x46a   :  { %v1412_v13 = vpop.eup %1411 }
 0x46b   :  { %v810_v37 = vmul.f32 %v1412_v13, %v807_v7  ;;  %vm815_vm5 = vweird.f32 %v1412_v13 }
 0x46c   :  { %vm816_vm7 = vmor %vm814_vm0, %vm815_vm5 }
 0x46d   :  { %v811_v14 = vsub.f32 1.0, %v810_v37 }
 0x46f   :  { %v812_v26 = vmul.f32 %v1412_v13, %v811_v14 }
 0x471   :  { %v813_v27 = vadd.f32 %v1412_v13, %v812_v26 }
 0x473   :  { %v817_v35 = vsel %vm816_vm7, %v1412_v13, %v813_v27 }
 0x474   :  { %v822_v38 = vsel %vm819_vm9, %v821_v36, %v817_v35 }
 0x475   :  { %v839_v39 = vsel %vm805_vm12, %v822_v38, 0.0 }
 0x4ce   :  { %v567_v19 = vpop.f32.mrf.mxu3 }
 0x4cf   :  { %v1824_v20 = vadd.f32 %v1390_v41, %v567_v19 }
 0x4d1   :  { %1323 = vmatmul.msk.f32.vlgmr.msra.gmra.mxu2 %vm278_vm1, %v1824_v20 }
 0x4d6   :  { %v570_v30 = vpop.f32.mrf.mxu3 }
 0x4d7   :  { %v1828_v33 = vadd.f32 %v1390_v41, %v570_v30 }
 0x4d9   :  { %1324 = vmatmul.msk.f32.gmra.mxu2 %vm278_vm1, %v1828_v33 }
 0x4de   :  { %v864_v42 = vpop.f32.mrf.mxu3 }
 0x4df   :  { %v870_v43 = vmul.f32 %v864_v42, %v839_v39 }
 0x4e1   :  { %v880_v44 = vsel %vm92_vm6, %v870_v43, %v1753_v54 }
 0x4e2   :  { %1333 = vmatmul.msk.f32.vlgmr.msrb.gmra.mxu2 %vm513_vm8, %v880_v44 }
 0x4e6   :  { %v867_v34 = vpop.f32.mrf.mxu3 }
 0x554   :  { %v596_v45 = vpop.f32.mrf.mxu2 }
 0x55c   :  { %v599_v28 = vpop.f32.mrf.mxu2 }
 0x55d   :  { %v1370_v5 = vpack.i.bf16 %v596_v45, %v599_v28 }
 0x55f   :  { %1371 = vrot.lane.b32.xlu2 %v1370_v5, %s1473_s6 }
 0x567   :  { %610 = vrot.lane.b32.xlu2 %v1283_v1, %s1470_s7 }
 0x590   :  { %803 = vadd.xlane.f32.xlu2 %v802_v4 }
 0x5b9   :  { %v1372_v54 = vpop.permute.xlu2 %1371 }
 0x5ba   :  { %v1373_v46 = vunpack.i.l.bf16 %v1372_v54  ;;  %v1374_v47 = vunpack.i.h.bf16 %v1372_v54 }
 0x5bc   :  { %655 = vmatpush.msra.mxu0 %v1373_v46 }
 0x5be   :  { %656 = vmatpush.msra.mxu0 %v1374_v47 }
 0x5c0   :  { %657 = vmatpush.msra.mxu0 %v599_v28 }
 0x5c1   :  { %v611_v48 = vpop.permute.xlu2 %610 }
 0x5c2   :  { %658 = vmatpush.msra.mxu0 %v596_v45  ;;  %v620_v56 = vsel %vm213_vm14, %v1279_v40, %v611_v48 }
 0x5c3   :  { %1325 = vmatmul.msk.f32.vlgmr.msra.gmra.mxu0 %vm92_vm6, %v1689_v57  ;;  %v621_v57 = vsel %vm213_vm14, %v1280_v49, %v1747_v50 }
 0x5cb   :  { %1326 = vmatmul.msk.f32.gmra.mxu0 %vm92_vm6, %v1783_v51 }
 0x5d3   :  { %1327 = vmatmul.msk.f32.gmra.mxu0 %vm92_vm6, %v620_v56 }
 0x5db   :  { %1328 = vmatmul.msk.f32.gmra.mxu0 %vm92_vm6, %v621_v57 }
 0x603   :  { %v804_v51 = vpop.xlane.xlu2 %803 }
 0x604   :  { %v808_v52 = vmax.f32 %v804_v51, 1.0  ;;  %vm806_vm5 = vcmp.gt.f32.partialorder %v804_v51, 0.0 }
 0x606   :  { %1413 = vrcp.f32 %v808_v52  ;;  %v835_v0 = vand.u32 2147483648, %v808_v52  ;;  %v833_v2 = vand.u32 2147483647, %v808_v52  ;;  %vm829_vm15 = vweird.f32 %v808_v52 }
 0x608   :  { %v836_v11 = vor.u32 1.1754944e-38, %v835_v0  ;;  %vm834_vm2 = vcmp.eq.f32.partialorder %v833_v2, 8.507059e+37 }
 0x60c   :  { %v1414_v53 = vpop.eup %1413 }
 0x60d   :  { %v825_v15 = vmul.f32 %v1414_v53, %v808_v52  ;;  %vm830_vm3 = vweird.f32 %v1414_v53 }
 0x60e   :  { %vm831_vm4 = vmor %vm829_vm15, %vm830_vm3 }
 0x60f   :  { %v826_v55 = vsub.f32 1.0, %v825_v15 }
 0x611   :  { %v827_v58 = vmul.f32 %v1414_v53, %v826_v55 }
 0x613   :  { %v828_v12 = vadd.f32 %v1414_v53, %v827_v58 }
 0x615   :  { %v832_v59 = vsel %vm831_vm4, %v1414_v53, %v828_v12 }
 0x616   :  { %v837_v50 = vsel %vm834_vm2, %v836_v11, %v832_v59 }
 0x617   :  { %v840_v62 = vsel %vm806_vm5, %v837_v50, 0.0  ;;  %vm1986_vm5 = vcmp.eq.s32.totalorder %v1538_v8, %v1536_v6 }
 0x618   :  { %v871_v16 = vmul.f32 %v867_v34, %v840_v62  ;;  %v1296_v21 = vsel %vm1986_vm5, 1.0, %v1468_v17  ;;  %vm1244_vm5 = vcmask 25600  }
 0x61a   :  { %v881_v3 = vsel %vm92_vm6, %v871_v16, %v1755_v60 }
 0x61b   :  { %1334 = vmatmul.msk.f32.gmra.mxu2 %vm513_vm8, %v881_v3  ;;  %vm684_vm8 = vcmask 7168  }
 0x640   :  { %v660_v63 = vpop.f32.mrf.mxu0 }
 0x641   :  { %v661_v37 = vadd.f32 %v1392_v10, %v660_v63 }
 0x643   :  { %v676_v19 = vmul.f32 0.2, %v661_v37  ;;  %vm672_vm7 = vcmp.gt.f32.partialorder %v661_v37, 0.0 }
 0x645   :  { %v680_v30 = vsel %vm672_vm7, %v661_v37, %v676_v19 }
 0x646   :  { %v685_v39 = vsel %vm684_vm8, %v680_v30, -inf }
 0x648   :  { %v663_v7 = vpop.f32.mrf.mxu0 }
 0x649   :  { %v664_v13 = vadd.f32 %v1392_v10, %v663_v7 }
 0x64b   :  { %v677_v14 = vmul.f32 0.2, %v664_v13  ;;  %vm673_vm0 = vcmp.gt.f32.partialorder %v664_v13, 0.0 }
 0x64d   :  { %v681_v60 = vsel %vm673_vm0, %v664_v13, %v677_v14 }
 0x64e   :  { %v686_v36 = vsel %vm684_vm8, %v681_v60, -inf }
 0x64f   :  { %v689_v44 = vmax.f32 %v685_v39, %v686_v36  ;;  %v794_v39 = vld [vmem:[%s1981_s4 + $0xd8] sm:$0xff] }
 0x650   :  { %v666_v61 = vpop.f32.mrf.mxu0 }
 0x651   :  { %v667_v41 = vadd.f32 %v1392_v10, %v666_v61 }
 0x653   :  { %v678_v26 = vmul.f32 0.2, %v667_v41  ;;  %vm674_vm9 = vcmp.gt.f32.partialorder %v667_v41, 0.0 }
 0x655   :  { %v682_v31 = vsel %vm674_vm9, %v667_v41, %v678_v26 }
 0x656   :  { %v687_v42 = vsel %vm684_vm8, %v682_v31, -inf }
 0x658   :  { %v669_v27 = vpop.f32.mrf.mxu0 }
 0x659   :  { %v670_v29 = vadd.f32 %v1392_v10, %v669_v27 }
 0x65b   :  { %vm675_vm12 = vcmp.gt.f32.partialorder %v670_v29, 0.0  ;;  %v679_v35 = vmul.f32 0.2, %v670_v29 }
 0x65d   :  { %v683_v38 = vsel %vm675_vm12, %v670_v29, %v679_v35 }
 0x65e   :  { %v688_v43 = vsel %vm684_vm8, %v683_v38, -inf }
 0x65f   :  { %v690_v45 = vmax.f32 %v687_v42, %v688_v43  ;;  %v1391_v42 = vld [vmem:[%s1981_s4 + $0xa8] ss:$0 sm:$0xff]  ;;  %v906_v43 = vpop.f32.mrf.mxu2 }
 0x661   :  { %v691_v28 = vmax.f32 %v689_v44, %v690_v45  ;;  %v907_v44 = vadd.f32 %v1391_v42, %v906_v43 }
 0x663   :  { %v692_v5 = vrot.slane %v691_v28, 4 }
 0x665   :  { %v693_v32 = vmax.f32 %v691_v28, %v692_v5 }
 0x667   :  { %v694_v1 = vrot.slane %v693_v32, 2 }
 0x669   :  { %v695_v4 = vmax.f32 %v693_v32, %v694_v1  ;;  %v1393_v32 = vld [vmem:[%s1981_s4 + $0xe8] ss:$0 sm:$0xff] }
 0x66b   :  { %v696_v54 = vrot.slane %v695_v4, 1 }
 0x66d   :  { %v697_v46 = vmax.f32 %v695_v4, %v696_v54 }
 0x66f   :  { %v698_v47 = vsub.f32 %v680_v30, %v697_v46  ;;  %v699_v48 = vsub.f32 %v681_v60, %v697_v46  ;;  %v700_v40 = vsub.f32 %v682_v31, %v697_v46  ;;  %v701_v56 = vsub.f32 %v683_v38, %v697_v46  ;;  %v795_v38 = vld [vmem:[%s1981_s4 + $0xe0] sm:$0xff] }
 0x671   :  { %v702_v49 = vmul.f32 1.442695, %v698_v47  ;;  %v704_v57 = vmul.f32 1.442695, %v699_v48  ;;  %v706_v51 = vmul.f32 1.442695, %v700_v40 }
 0x672   :  { %v708_v52 = vmul.f32 1.442695, %v701_v56  ;;  %v158_v56 = vpop.permute.xlu0 %157 }
 0x673   :  { %1415 = vpow2.f32 %v702_v49  ;;  %vm162_vm2 = vcmp.eq.s32.totalorder %v1538_v8, %v158_v56 }
 0x674   :  { %1417 = vpow2.f32 %v704_v57  ;;  %v1300_v49 = vsel %vm162_vm2, 1.0, %v1468_v17 }
 0x675   :  { %1419 = vpow2.f32 %v706_v51 }
 0x676   :  { %1421 = vpow2.f32 %v708_v52  ;;  %v976_v52 = vpop.permute.xlu1 %975 }
 0x679   :  { %v1416_v53 = vpop.eup %1415 }
 0x67a   :  { %v1418_v15 = vpop.eup %1417  ;;  %v710_v55 = vsel %vm684_vm8, %v1416_v53, 0.0 }
 0x67b   :  { %v1420_v0 = vpop.eup %1419  ;;  %v711_v58 = vsel %vm684_vm8, %v1418_v15, 0.0 }
 0x67c   :  { %v1422_v2 = vpop.eup %1421  ;;  %v712_v12 = vadd.f32 %v711_v58, %v710_v55  ;;  %v713_v11 = vsel %vm684_vm8, %v1420_v0, 0.0  ;;  %v1294_v58 = vsel %vm136_vm10, 1.0, %v1468_v17 }
 0x67d   :  { %v715_v50 = vsel %vm684_vm8, %v1422_v2, 0.0 }
 0x67e   :  { %v714_v59 = vadd.f32 %v713_v11, %v712_v12 }
 0x680   :  { %v716_v34 = vadd.f32 %v715_v50, %v714_v59 }
 0x682   :  { %v717_v62 = vrot.slane %v716_v34, 4 }
 0x684   :  { %v718_v16 = vadd.f32 %v717_v62, %v716_v34 }
 0x686   :  { %v719_v3 = vrot.slane %v718_v16, 2 }
 0x688   :  { %v720_v63 = vadd.f32 %v719_v3, %v718_v16 }
 0x68a   :  { %v721_v7 = vrot.slane %v720_v63, 1 }
 0x68c   :  { %v722_v10 = vadd.f32 %v721_v7, %v720_v63 }
 0x68e   :  { %1423 = vrcp.f32 %v722_v10  ;;  %v734_v41 = vand.u32 2147483648, %v722_v10  ;;  %v732_v19 = vand.u32 2147483647, %v722_v10  ;;  %vm728_vm3 = vweird.f32 %v722_v10 }
 0x690   :  { %v735_v27 = vor.u32 1.1754944e-38, %v734_v41  ;;  %vm733_vm4 = vcmp.eq.f32.partialorder %v732_v19, 8.507059e+37 }
 0x694   :  { %v1424_v61 = vpop.eup %1423 }
 0x695   :  { %v724_v13 = vmul.f32 %v1424_v61, %v722_v10  ;;  %vm729_vm13 = vweird.f32 %v1424_v61 }
 0x696   :  { %vm730_vm15 = vmor %vm728_vm3, %vm729_vm13  ;;  %vm1182_vm3 = vcmask 58368  }
 0x697   :  { %v725_v37 = vsub.f32 1.0, %v724_v13 }
 0x699   :  { %v726_v14 = vmul.f32 %v1424_v61, %v725_v37 }
 0x69b   :  { %v727_v26 = vadd.f32 %v1424_v61, %v726_v14 }
 0x69d   :  { %v731_v60 = vsel %vm730_vm15, %v1424_v61, %v727_v26 }
 0x69e   :  { %v736_v29 = vsel %vm733_vm4, %v735_v27, %v731_v60  ;;  %v909_v45 = vpop.f32.mrf.mxu2 }
 0x69f   :  { %v740_v30 = vmul.f32 %v1422_v2, %v736_v29  ;;  %v739_v31 = vmul.f32 %v1420_v0, %v736_v29  ;;  %v738_v35 = vmul.f32 %v1418_v15, %v736_v29  ;;  %v737_v36 = vmul.f32 %v1416_v53, %v736_v29  ;;  %v978_v0 = vpop.permute.xlu1 %977 }
 0x6a0   :  { %v910_v28 = vadd.f32 %v1391_v42, %v909_v45  ;;  %v1293_v15 = vsel %vm135_vm11, 1.0, %v1468_v17  ;;  %v988_v2 = vsel %vm213_vm14, %v1294_v58, %v978_v0  ;;  %vm1985_vm11 = vcmp.eq.s32.totalorder %v1538_v8, %v1540_v9  ;;  %v1394_v9 = vld [vmem:[%s1981_s4 + $0xf8] ss:$0 sm:$0xff] }
 0x6a1   :  { %753 = vmatpush.msra.mxu1 %v740_v30  ;;  %v987_v55 = vsel %vm213_vm14, %v1293_v15, %v976_v52  ;;  %v1295_v22 = vsel %vm1985_vm11, 1.0, %v1468_v17 }
 0x6a3   :  { %754 = vmatpush.msra.mxu1 %v739_v31 }
 0x6a5   :  { %755 = vmatpush.msra.mxu1 %v738_v35 }
 0x6a7   :  { %756 = vmatpush.msra.mxu1 %v737_v36  ;;  %v980_v12 = vpop.permute.xlu1 %979 }
 0x6a8   :  { %1329 = vmatmul.msk.f32.vlgmr.msra.gmra.mxu1 %vm92_vm6, %v1579_v18  ;;  %v797_v18 = vld [vmem:[%s1981_s4 + $0xf0] sm:$0xff]  ;;  %v989_v11 = vsel %vm213_vm14, %v1295_v22, %v980_v12 }
 0x6a9   :  { %933 = vmatpush.msrb.mxu1 %v795_v38  ;;  %963 = vmatpush.msrb.mxu3 %v797_v18 }
 0x6ab   :  { %934 = vmatpush.msrb.mxu1 %v794_v39 }
 0x6b0   :  { %1330 = vmatmul.msk.f32.gmra.mxu1 %vm92_vm6, %v1606_v24 }
 0x6b8   :  { %1335 = vmatmul.msk.f32.vlgmr.msrb.gmra.mxu1 %vm213_vm14, %v907_v44 }
 0x6c0   :  { %1336 = vmatmul.msk.f32.gmra.mxu1 %vm213_vm14, %v910_v28 }
 0x725   :  { %v758_v5 = vpop.f32.mrf.mxu1 }
 0x726   :  { %766 = vperm.xlu1 %1382, %v758_v5  }
 0x72d   :  { %v761_v24 = vpop.f32.mrf.mxu1 }
 0x735   :  { %v936_v1 = vpop.f32.mrf.mxu1 }
 0x736   :  { %v1893_v4 = vadd.f32 %v1393_v32, %v936_v1 }
 0x738   :  { %1337 = vmatmul.msk.f32.vlgmr.msrb.gmra.mxu3 %vm278_vm1, %v1893_v4 }
 0x73d   :  { %v939_v54 = vpop.f32.mrf.mxu1 }
 0x73e   :  { %v1897_v46 = vadd.f32 %v1393_v32, %v939_v54 }
 0x740   :  { %1338 = vmatmul.msk.f32.gmra.mxu3 %vm278_vm1, %v1897_v46 }
 0x7bb   :  { %v965_v47 = vpop.f32.mrf.mxu3 }
 0x7c3   :  { %v968_v48 = vpop.f32.mrf.mxu3 }
 0x7c4   :  { %v1377_v40 = vpack.i.bf16 %v965_v47, %v968_v48 }
 0x7c6   :  { %1378 = vrot.lane.b32.xlu2 %v1377_v40, %s1473_s6 }
 0x7ce   :  { %981 = vrot.lane.b32.xlu2 %v1300_v49, %s1470_s7 }
 0x7d6   :  { %771 = vperm.xlu2 %1383, %v761_v24  }
 0x820   :  { %v1379_v57 = vpop.permute.xlu2 %1378 }
 0x821   :  { %v1380_v51 = vunpack.i.l.bf16 %v1379_v57  ;;  %v1381_v53 = vunpack.i.h.bf16 %v1379_v57 }
 0x823   :  { %1024 = vmatpush.msra.mxu2 %v1380_v51 }
 0x825   :  { %1025 = vmatpush.msra.mxu2 %v1381_v53 }
 0x827   :  { %1026 = vmatpush.msra.mxu2 %v968_v48 }
 0x828   :  { %v982_v59 = vpop.permute.xlu2 %981 }
 0x829   :  { %1027 = vmatpush.msra.mxu2 %v965_v47  ;;  %v990_v50 = vsel %vm213_vm14, %v1296_v21, %v982_v59 }
 0x82a   :  { %1339 = vmatmul.msk.f32.vlgmr.msra.gmra.mxu2 %vm92_vm6, %v987_v55 }
 0x832   :  { %1340 = vmatmul.msk.f32.gmra.mxu2 %vm92_vm6, %v988_v2 }
 0x83a   :  { %1341 = vmatmul.msk.f32.gmra.mxu2 %vm92_vm6, %v989_v11 }
 0x842   :  { %1342 = vmatmul.msk.f32.gmra.mxu2 %vm92_vm6, %v990_v50 }
 0x8ad   :  { %v1029_v34 = vpop.f32.mrf.mxu2 }
 0x8ae   :  { %v1030_v63 = vadd.f32 %v1394_v9, %v1029_v34 }
 0x8b0   :  { %v1045_v61 = vmul.f32 0.2, %v1030_v63  ;;  %vm1041_vm0 = vcmp.gt.f32.partialorder %v1030_v63, 0.0 }
 0x8b2   :  { %v1049_v37 = vsel %vm1041_vm0, %v1030_v63, %v1045_v61 }
 0x8b3   :  { %v1053_v27 = vsel %vm684_vm8, %v1049_v37, -inf }
 0x8b5   :  { %v1032_v62 = vpop.f32.mrf.mxu2 }
 0x8b6   :  { %v1033_v3 = vadd.f32 %v1394_v9, %v1032_v62 }
 0x8b8   :  { %v1046_v10 = vmul.f32 0.2, %v1033_v3  ;;  %vm1042_vm10 = vcmp.gt.f32.partialorder %v1033_v3, 0.0 }
 0x8ba   :  { %v1050_v8 = vsel %vm1042_vm10, %v1033_v3, %v1046_v10 }
 0x8bb   :  { %v1054_v19 = vsel %vm684_vm8, %v1050_v8, -inf }
 0x8bc   :  { %v1057_v30 = vmax.f32 %v1053_v27, %v1054_v19 }
 0x8bd   :  { %v1035_v16 = vpop.f32.mrf.mxu2 }
 0x8be   :  { %v1036_v7 = vadd.f32 %v1394_v9, %v1035_v16 }
 0x8c0   :  { %v1047_v13 = vmul.f32 0.2, %v1036_v7  ;;  %vm1043_vm7 = vcmp.gt.f32.partialorder %v1036_v7, 0.0 }
 0x8c2   :  { %v1051_v41 = vsel %vm1043_vm7, %v1036_v7, %v1047_v13 }
 0x8c3   :  { %v1055_v60 = vsel %vm684_vm8, %v1051_v41, -inf }
 0x8c5   :  { %v1038_v6 = vpop.f32.mrf.mxu2 }
 0x8c6   :  { %v1039_v17 = vadd.f32 %v1394_v9, %v1038_v6 }
 0x8c8   :  { %vm1044_vm14 = vcmp.gt.f32.partialorder %v1039_v17, 0.0  ;;  %v1048_v14 = vmul.f32 0.2, %v1039_v17 }
 0x8ca   :  { %v1052_v26 = vsel %vm1044_vm14, %v1039_v17, %v1048_v14  ;;  %v1156_v14 = vld [vmem:[%s1981_s4 + $0x100] sm:$0xff] }
 0x8cb   :  { %v1056_v29 = vsel %vm684_vm8, %v1052_v26, -inf  ;;  %1177 = vmatpush.msra.mxu1 %v1156_v14 }
 0x8cc   :  { %v1058_v31 = vmax.f32 %v1055_v60, %v1056_v29 }
 0x8ce   :  { %v1059_v35 = vmax.f32 %v1057_v30, %v1058_v31 }
 0x8d0   :  { %v1060_v36 = vrot.slane %v1059_v35, 4 }
 0x8d2   :  { %v1061_v38 = vmax.f32 %v1059_v35, %v1060_v36 }
 0x8d4   :  { %v1062_v39 = vrot.slane %v1061_v38, 2 }
 0x8d6   :  { %v1063_v42 = vmax.f32 %v1061_v38, %v1062_v39 }
 0x8d8   :  { %v1064_v43 = vrot.slane %v1063_v42, 1 }
 0x8da   :  { %v1065_v44 = vmax.f32 %v1063_v42, %v1064_v43 }
 0x8dc   :  { %v1066_v45 = vsub.f32 %v1049_v37, %v1065_v44  ;;  %v1067_v28 = vsub.f32 %v1050_v8, %v1065_v44  ;;  %v1068_v18 = vsub.f32 %v1051_v41, %v1065_v44  ;;  %v1069_v5 = vsub.f32 %v1052_v26, %v1065_v44  ;;  %v772_v37 = vpop.permute.xlu2 %771  ;;  %v767_v41 = vpop.permute.xlu1 %766 }
 0x8dd   :  { %v775_v19 = vmul.f32 %v772_v37, %v1828_v33  ;;  %v774_v26 = vmul.f32 %v767_v41, %v1824_v20 }
 0x8de   :  { %v1070_v24 = vmul.f32 1.442695, %v1066_v45  ;;  %v1072_v32 = vmul.f32 1.442695, %v1067_v28  ;;  %v1074_v1 = vmul.f32 1.442695, %v1068_v18 }
 0x8df   :  { %v1076_v54 = vmul.f32 1.442695, %v1069_v5  ;;  %v776_v27 = vsel %vm278_vm1, %v774_v26, 0.0 }
 0x8e0   :  { %1425 = vpow2.f32 %v1070_v24 }
 0x8e1   :  { %1427 = vpow2.f32 %v1072_v32 }
 0x8e2   :  { %1429 = vpow2.f32 %v1074_v1 }
 0x8e3   :  { %1431 = vpow2.f32 %v1076_v54 }
 0x8e6   :  { %v1426_v47 = vpop.eup %1425 }
 0x8e7   :  { %v1428_v48 = vpop.eup %1427  ;;  %v1078_v40 = vsel %vm684_vm8, %v1426_v47, 0.0 }
 0x8e8   :  { %v1430_v56 = vpop.eup %1429  ;;  %v1079_v49 = vsel %vm684_vm8, %v1428_v48, 0.0 }
 0x8e9   :  { %v1432_v57 = vpop.eup %1431  ;;  %v1080_v51 = vadd.f32 %v1079_v49, %v1078_v40  ;;  %v1081_v52 = vsel %vm684_vm8, %v1430_v56, 0.0  ;;  %v1474_v40 = vmov 8.0  }
 0x8ea   :  { %v1083_v15 = vsel %vm684_vm8, %v1432_v57, 0.0 }
 0x8eb   :  { %v1082_v53 = vadd.f32 %v1081_v52, %v1080_v51 }
 0x8ed   :  { %v1084_v55 = vadd.f32 %v1083_v15, %v1082_v53 }
 0x8ef   :  { %v1085_v0 = vrot.slane %v1084_v55, 4 }
 0x8f1   :  { %v1086_v58 = vadd.f32 %v1085_v0, %v1084_v55 }
 0x8f3   :  { %v1087_v2 = vrot.slane %v1086_v58, 2 }
 0x8f5   :  { %v1088_v12 = vadd.f32 %v1087_v2, %v1086_v58 }
 0x8f7   :  { %v1089_v22 = vrot.slane %v1088_v12, 1 }
 0x8f9   :  { %v1090_v11 = vadd.f32 %v1089_v22, %v1088_v12  ;;  %v1218_v12 = vld [vmem:[%s1981_s4 + $0x120] sm:$0xff] }
 0x8fa   :  { %1239 = vmatpush.msrb.mxu1 %v1218_v12 }
 0x8fb   :  { %1433 = vrcp.f32 %v1090_v11  ;;  %v1102_v34 = vand.u32 2147483648, %v1090_v11  ;;  %v1100_v9 = vand.u32 2147483647, %v1090_v11  ;;  %vm1096_vm12 = vweird.f32 %v1090_v11 }
 0x8fc   :  { %1435 = vrcp.f32 %v1474_v40 }
 0x8fd   :  { %v1103_v3 = vor.u32 1.1754944e-38, %v1102_v34  ;;  %vm1101_vm8 = vcmp.eq.f32.partialorder %v1100_v9, 8.507059e+37 }
 0x901   :  { %v1434_v59 = vpop.eup %1433 }
 0x902   :  { %v1092_v21 = vmul.f32 %v1434_v59, %v1090_v11  ;;  %vm1097_vm9 = vweird.f32 %v1434_v59 }
 0x903   :  { %vm1098_vm13 = vmor %vm1096_vm12, %vm1097_vm9 }
 0x904   :  { %v1093_v50 = vsub.f32 1.0, %v1092_v21 }
 0x906   :  { %v1094_v62 = vmul.f32 %v1434_v59, %v1093_v50 }
 0x908   :  { %v1095_v16 = vadd.f32 %v1434_v59, %v1094_v62 }
 0x90a   :  { %v1099_v63 = vsel %vm1098_vm13, %v1434_v59, %v1095_v16 }
 0x90b   :  { %v1104_v7 = vsel %vm1101_vm8, %v1103_v3, %v1099_v63  ;;  %v1396_v3 = vld [vmem:[%s1981_s4 + $0x110] ss:$0 sm:$0xff] }
 0x90c   :  { %v1108_v10 = vmul.f32 %v1432_v57, %v1104_v7  ;;  %v1107_v61 = vmul.f32 %v1430_v56, %v1104_v7  ;;  %v1106_v13 = vmul.f32 %v1428_v48, %v1104_v7  ;;  %v1105_v6 = vmul.f32 %v1426_v47, %v1104_v7  ;;  %v1436_v56 = vpop.eup %1435 }
 0x90d   :  { %v1187_v49 = vmul.f32 8.0, %v1436_v56  ;;  %vm1191_vm15 = vweird.f32 %v1436_v56 }
 0x90e   :  { %1121 = vmatpush.msrb.mxu0 %v1108_v10  ;;  %v1397_v10 = vld [vmem:[%s1981_s4 + $0x118] ss:$0 sm:$0xff] }
 0x90f   :  { %v1188_v57 = vsub.f32 1.0, %v1187_v49 }
 0x910   :  { %1122 = vmatpush.msrb.mxu0 %v1107_v61 }
 0x911   :  { %v1189_v51 = vmul.f32 %v1436_v56, %v1188_v57 }
 0x912   :  { %1123 = vmatpush.msrb.mxu0 %v1106_v13 }
 0x913   :  { %v1190_v52 = vadd.f32 %v1436_v56, %v1189_v51 }
 0x914   :  { %1124 = vmatpush.msrb.mxu0 %v1105_v6  ;;  %v1398_v6 = vld [vmem:[%s1981_s4 + $0x128] ss:$0 sm:$0xff] }
 0x915   :  { %1343 = vmatmul.msk.f32.vlgmr.msrb.gmra.mxu0 %vm92_vm6, %v1603_v23  ;;  %v777_v23 = vsel %vm278_vm1, %v775_v19, 0.0  ;;  %v1192_v53 = vsel %vm1191_vm15, %v1436_v56, %v1190_v52 }
 0x91d   :  { %1344 = vmatmul.msk.f32.gmra.mxu0 %vm92_vm6, %v1616_v25  ;;  %v778_v25 = vadd.f32 %v777_v23, %v776_v27  ;;  %vm1153_vm6 = vcmask 1040384  }
 0x91f   :  { %v779_v60 = vrot.slane %v778_v25, 4 }
 0x921   :  { %v780_v31 = vadd.f32 %v779_v60, %v778_v25 }
 0x923   :  { %v781_v39 = vrot.slane %v780_v31, 2 }
 0x925   :  { %v782_v43 = vadd.f32 %v781_v39, %v780_v31 }
 0x927   :  { %v783_v28 = vrot.slane %v782_v43, 1 }
 0x929   :  { %v784_v24 = vadd.f32 %v783_v28, %v782_v43 }
 0x992   :  { %v1126_v8 = vpop.f32.mrf.mxu0 }
 0x993   :  { %1134 = vperm.xlu1 %1382, %v1126_v8  }
 0x99a   :  { %v1129_v17 = vpop.f32.mrf.mxu0 }
 0x99b   :  { %1139 = vperm.xlu0 %1384, %v1129_v17  }
 0xa05   :  { %v1135_v29 = vpop.permute.xlu1 %1134 }
 0xa06   :  { %v1142_v30 = vmul.f32 %v1135_v29, %v1893_v4 }
 0xa08   :  { %v1144_v38 = vsel %vm278_vm1, %v1142_v30, 0.0 }
 0xa0d   :  { %v1140_v35 = vpop.permute.xlu0 %1139 }
 0xa0e   :  { %v1143_v36 = vmul.f32 %v1140_v35, %v1897_v46  ;;  %v1395_v46 = vld [vmem:[%s1981_s4 + $0x108] ss:$0 sm:$0xff] }
 0xa10   :  { %v1145_v33 = vsel %vm278_vm1, %v1143_v36, 0.0 }
 0xa11   :  { %v1146_v42 = vadd.f32 %v1145_v33, %v1144_v38 }
 0xa13   :  { %v1147_v20 = vrot.slane %v1146_v42, 4 }
 0xa15   :  { %v1148_v44 = vadd.f32 %v1147_v20, %v1146_v42 }
 0xa17   :  { %v1149_v45 = vrot.slane %v1148_v44, 2 }
 0xa19   :  { %v1150_v18 = vadd.f32 %v1149_v45, %v1148_v44 }
 0xa1b   :  { %v1151_v5 = vrot.slane %v1150_v18, 1 }
 0xa1d   :  { %v1152_v4 = vadd.f32 %v1151_v5, %v1150_v18 }
 0xa1f   :  { %v1154_v32 = vsel %vm1153_vm6, %v784_v24, %v1152_v4 }
 0xa20   :  { %v1155_v1 = vmax.f32 %v1154_v32, 0.0 }
 0xa22   :  { %1345 = vmatmul.msk.f32.vlgmr.msra.gmra.mxu1 %vm278_vm1, %v1155_v1 }
 0xa9f   :  { %v1179_v54 = vpop.f32.mrf.mxu1 }
 0xaa0   :  { %v1180_v47 = vadd.f32 %v1395_v46, %v1179_v54 }
 0xaa2   :  { %v1183_v48 = vsel %vm1182_vm3, %v1180_v47, 0.0 }
 0xaa3   :  { %1184 = vadd.xlane.f32.xlu2 %v1183_v48 }
 0xb16   :  { %v1185_v15 = vpop.xlane.xlu2 %1184 }
 0xb17   :  { %v1193_v55 = vmul.f32 %v1192_v53, %v1185_v15 }
 0xb19   :  { %v1194_v0 = vsub.f32 %v1180_v47, %v1193_v55 }
 0xb1b   :  { %v1195_v58 = vmul.f32 %v1194_v0, %v1194_v0 }
 0xb1d   :  { %v1196_v2 = vsel %vm1182_vm3, %v1195_v58, 0.0 }
 0xb1e   :  { %1197 = vadd.xlane.f32.xlu1 %v1196_v2 }
 0xb91   :  { %v1198_v22 = vpop.xlane.xlu1 %1197 }
 0xb92   :  { %v1199_v11 = vmul.f32 %v1198_v22, %v1192_v53 }
 0xb94   :  { %v1200_v59 = vadd.f32 1e-05, %v1199_v11 }
 0xb96   :  { %1437 = vrsqrt.f32 %v1200_v59  ;;  %vm1207_vm2 = vweird.f32 %v1200_v59 }
 0xb9c   :  { %v1438_v21 = vpop.eup %1437 }
 0xb9d   :  { %v1202_v50 = vmul.f32 %v1438_v21, %v1200_v59  ;;  %vm1208_vm4 = vweird.f32 %v1438_v21 }
 0xb9e   :  { %vm1209_vm11 = vmor %vm1207_vm2, %vm1208_vm4 }
 0xb9f   :  { %v1203_v34 = vmul.f32 %v1438_v21, %v1202_v50 }
 0xba1   :  { %v1204_v62 = vmul.f32 0.5, %v1203_v34 }
 0xba3   :  { %v1205_v9 = vsub.f32 1.5, %v1204_v62 }
 0xba5   :  { %v1206_v16 = vmul.f32 %v1438_v21, %v1205_v9 }
 0xba7   :  { %v1210_v63 = vsel %vm1209_vm11, %v1438_v21, %v1206_v16 }
 0xba8   :  { %v1211_v7 = vmul.f32 %v1210_v63, %v1194_v0 }
 0xbaa   :  { %v1214_v61 = vmul.f32 %v1396_v3, %v1211_v7 }
 0xbac   :  { %v1217_v13 = vadd.f32 %v1397_v10, %v1214_v61 }
 0xbae   :  { %1346 = vmatmul.msk.f32.vlgmr.msrb.gmra.mxu1 %vm278_vm1, %v1217_v13  ;;  %vm1257_vm1 = vcmask 0  }
 0xc2b   :  { %v1241_v8 = vpop.f32.mrf.mxu1 }
 0xc2c   :  { %v1242_v17 = vadd.f32 %v1398_v6, %v1241_v8 }
 0xc2e   :  { %v1245_v37 = vsel %vm1244_vm5, %v1242_v17, 0.0 }
 0xc2f   :  { %1246 = vadd.xlane.f32.xlu0 %v1245_v37 }
 0xca2   :  { %v1247_v41 = vpop.xlane.xlu0 %1246 }
 0xca3   :  { %v1248_v14 = vrot.slane %v1247_v41, 4 }
 0xca5   :  { %v1249_v19 = vadd.f32 %v1248_v14, %v1247_v41 }
 0xca7   :  { %v1250_v26 = vrot.slane %v1249_v19, 2 }
 0xca9   :  { %v1251_v23 = vadd.f32 %v1250_v26, %v1249_v19 }
 0xcab   :  { %v1252_v27 = vrot.slane %v1251_v23, 1 }
 0xcad   :  { %v1253_v25 = vadd.f32 %v1252_v27, %v1251_v23 }
 0xcaf   :  { %1349 = vpush %v1253_v25 }
 0xce0   :  { %s1350_s4 = spop %1349 }
 0xce1   :  { %v1255_v60 = vstv %s1350_s4 }
 0xce2   :  { %v1256_v29 = vmul.f32 0.125, %v1255_v60 }
 0xce4   :  { %1258 = vst.msk [vmem:[#allocation2] sm:$0x1] %vm1257_vm1, %v1256_v29 }
 0xce5   :  { %1269 = dma.vmem_to_hbm [thread:$0]  %s1265_s30, 16, %s1267_s8, [#allocation3]  }
 0xce6   :  { %1463 = dma.done.wait [#allocation3], 16  }
 0xce7   :  { %1464 = vsyncadd [#allocation3], 4294967280 }
 0xce8   :  { %1274 = vsyncpa [#allocation3], 1 }

</bundles_post_ra>
